<compile_context>
chip_gen: v7x
topology: tpu7x:2x2x1
jax: 0.10.0
libtpu: 0.0.40
codegen_flags: <defaults>
</compile_context>

<pallas_src>
import jax
import jax.numpy as jnp
from jax.experimental import pallas as pl
from jax.experimental.pallas import tpu as pltpu


def _elu(z):
    return jnp.where(z > 0.0, z, jnp.exp(jnp.minimum(z, 0.0)) - 1.0)


# ----------------------------------------------------------------------------
# Fused Pallas kernel: conv1+BN1 -> pad1+conv2+BN2 -> pool2 -> pad2+conv3+BN3
#                      -> pool3 -> fc1 -> sigmoid, for ONE batch element.
# ----------------------------------------------------------------------------
def _eegnet_kernel(x_ref, w1_ref, p1_ref, b2_ref, p2_ref, sh2_ref, sw2_ref,
                   b3_ref, p3_ref, sw3_ref, wf_ref, bf_ref, o_ref):
    # --- stage 1: conv1 (1 x C) == one matmul, + ELU + folded BN1.
    # Row 16 of w1/p1 is all-zero and becomes the bottom pad row of padding1.
    xt = x_ref[0]                                                      # (C, T)
    z1 = jnp.dot(w1_ref[...], xt, preferred_element_type=jnp.float32) + p1_ref[0]
    h1 = _elu(z1) * p1_ref[1] + p1_ref[2]                              # (17, T)

    # --- stage 2: conv2 (2 x C//2) as two banded matmuls (padding1's left /
    # right zero columns folded into the bands), + ELU + folded BN2.
    # Columns = the 4 filters side by side (lane-dense: 4*W2 lanes).
    z2 = (jnp.dot(h1[:-1, :], b2_ref[0], preferred_element_type=jnp.float32)
          + jnp.dot(h1[1:, :], b2_ref[1], preferred_element_type=jnp.float32)
          + p2_ref[0])
    h2 = _elu(z2) * p2_ref[1] + p2_ref[2]                              # (16, 4*W2)

    # --- pool2: MaxPool2d(2, stride 4).  Row-pair max, then two 0/1 column
    # selectors gather columns 4*pw and 4*pw+1 of each filter (their max ==
    # 2-wide window max); the row selector picks rows 0,4,8,12 and also
    # inserts padding2's 4 top / 3 bottom zero rows.
    mh = jnp.maximum(h2[:-1, :], h2[1:, :])                            # (15, 4*W2)
    cmax = jnp.maximum(
        jnp.dot(mh, sw2_ref[0], preferred_element_type=jnp.float32),
        jnp.dot(mh, sw2_ref[1], preferred_element_type=jnp.float32))   # (15, 4*Wp2)
    p2v = jnp.dot(sh2_ref[...], cmax, preferred_element_type=jnp.float32)  # (11, 4*Wp2)

    # --- stage 3: conv3 (4 in-ch, 8 x 4) as 8 banded matmuls over the kernel
    # rows (padding2's left/right zero columns folded into the bands),
    # + ELU + folded BN3.  Columns = the 4 output filters side by side.
    z3 = p3_ref[0]
    for dh in range(8):
        z3 = z3 + jnp.dot(p2v[dh:dh + 4, :], b3_ref[dh],
                          preferred_element_type=jnp.float32)          # (4, 4*W3)
    h3 = _elu(z3) * p3_ref[1] + p3_ref[2]

    # --- pool3: MaxPool2d((2, 4)): row-pair max + max over the 4 per-offset
    # column selectors.
    mr = jnp.maximum(h3[:-1, :], h3[1:, :])                            # (3, 4*W3)
    sel = jnp.dot(mr, sw3_ref[0], preferred_element_type=jnp.float32)
    for dw in range(1, 4):
        sel = jnp.maximum(
            sel, jnp.dot(mr, sw3_ref[dw], preferred_element_type=jnp.float32))
    # sel rows 0 and 2 are the two MaxPool output rows                   (3, 4*Wp3)

    # --- flatten (== x.view(-1, T//2)) + fc1 + sigmoid.
    wf = wf_ref[...]
    z = jnp.sum(sel[0:1, :] * wf[0:1, :] + sel[2:3, :] * wf[1:2, :],
                axis=1, keepdims=True) + bf_ref[...]                   # (1, 1)
    o_ref[0] = 1.0 / (1.0 + jnp.exp(-z))


# ----------------------------------------------------------------------------
# Host-side (one-off) parameter preprocessing: fold BN, build banded conv
# matrices with the ZeroPad2d's folded in, and the pooling selection matrices.
# ----------------------------------------------------------------------------
def _fold_bn(bn):
    gamma, beta, mean, var = bn
    scale = (gamma * jax.lax.rsqrt(var)).reshape(-1)   # eps = 0 (BatchNorm2d(F, False))
    shift = beta.reshape(-1) - mean.reshape(-1) * scale
    return scale, shift


def build_constants(p, C, T):
    f32 = jnp.float32
    kw2 = C // 2
    W2 = (T + 33) - kw2 + 1          # conv2 output width (input width T+33 after pad1)
    Wp2 = (W2 - 2) // 4 + 1          # pool2 output width
    W3 = (Wp2 + 3) - 4 + 1           # conv3 output width (== Wp2)
    Wp3 = (W3 - 4) // 4 + 1          # pool3 output width
    assert 4 * 2 * Wp3 == T // 2, "EEGNet requires view(-1, T//2) to be batch-preserving"

    # stage 1: conv1 + folded BN1, extended with an all-zero row (pad1 bottom row).
    s1, t1 = _fold_bn(p["bn1"])
    w1e = jnp.concatenate([p["w1"].reshape(16, C), jnp.zeros((1, C), f32)], axis=0)
    b1e = jnp.concatenate([p["b1"], jnp.zeros((1,), f32)]).reshape(17, 1)
    s1e = jnp.concatenate([s1, jnp.ones((1,), f32)]).reshape(17, 1)
    t1e = jnp.concatenate([t1, jnp.zeros((1,), f32)]).reshape(17, 1)
    p1 = jnp.stack([b1e, s1e, t1e])                                    # (3, 17, 1)

    # stage 2: conv2 as banded matrices; pad1's left(16)/right(17) zero cols folded in.
    w2 = p["w2"].reshape(4, 2, kw2)
    dw = jnp.arange(T)[:, None] + 16 - jnp.arange(W2)[None, :]         # (T, W2)
    ok = (dw >= 0) & (dw < kw2)
    dwc = jnp.clip(dw, 0, kw2 - 1)
    B2 = jnp.stack([jnp.concatenate([jnp.where(ok, w2[f, dh][dwc], 0.0)
                                     for f in range(4)], axis=1)
                    for dh in range(2)])                               # (2, T, 4*W2)
    s2, t2 = _fold_bn(p["bn2"])
    p2 = jnp.stack([jnp.repeat(p["b2"], W2), jnp.repeat(s2, W2),
                    jnp.repeat(t2, W2)]).reshape(3, 1, 4 * W2)

    # pool2 selectors: SH2 picks rows 0,4,8,12 AND inserts pad2's 4 top / 3
    # bottom zero rows; SW2[dw] gathers columns 4*pw + dw of each filter chunk.
    r = jnp.arange(11)[:, None]
    c = jnp.arange(15)[None, :]
    SH2 = ((r >= 4) & (r <= 7) & (c == 4 * (r - 4))).astype(f32)       # (11, 15)
    r = jnp.arange(4 * W2)[:, None]
    c = jnp.arange(4 * Wp2)[None, :]
    base2 = W2 * (c // Wp2) + 4 * (c % Wp2)
    SW2 = jnp.stack([(r == base2 + dw).astype(f32) for dw in range(2)])  # (2, 4*W2, 4*Wp2)

    # stage 3: conv3 as banded matrices; pad2's left(2)/right(1) zero cols folded in.
    w3 = p["w3"]
    dw = jnp.arange(Wp2)[:, None] + 2 - jnp.arange(W3)[None, :]        # (Wp2, W3)
    ok = (dw >= 0) & (dw < 4)
    dwc = jnp.clip(dw, 0, 3)
    B3 = jnp.stack([jnp.concatenate(
        [jnp.concatenate([jnp.where(ok, w3[fo, ci, dh][dwc], 0.0) for fo in range(4)],
                         axis=1) for ci in range(4)], axis=0)
        for dh in range(8)])                                           # (8, 4*Wp2, 4*W3)
    s3, t3 = _fold_bn(p["bn3"])
    p3 = jnp.stack([jnp.repeat(p["b3"], W3), jnp.repeat(s3, W3),
                    jnp.repeat(t3, W3)]).reshape(3, 1, 4 * W3)

    # pool3 column selectors (kernel/stride width 4).
    r = jnp.arange(4 * W3)[:, None]
    c = jnp.arange(4 * Wp3)[None, :]
    base3 = W3 * (c // Wp3) + 4 * (c % Wp3)
    SW3 = jnp.stack([(r == base3 + dw).astype(f32) for dw in range(4)])  # (4, 4*W3, 4*Wp3)

    # fc1 weight reordered to the kernel's (pool_row, filter*Wp3 + pool_col) layout.
    wf_mat = p["wf"].reshape(4, 2, Wp3).transpose(1, 0, 2).reshape(2, 4 * Wp3)
    bf = p["bf"].reshape(1, 1)

    return (w1e, p1, B2, p2, SH2, SW2, B3, p3, SW3, wf_mat, bf)


# ----------------------------------------------------------------------------
# Forward pass: one fused pallas_call, grid over batch.
# ----------------------------------------------------------------------------
def eegnet_forward(x, params, C, T):
    """x: (N, 1, T, C) float32 (PyTorch NCHW layout) -> (N, 1) sigmoid outputs."""
    N = x.shape[0]
    consts = build_constants(params, C, T)
    xt = jnp.transpose(x.reshape(N, T, C), (0, 2, 1))      # (N, C, T); input-only permute

    in_specs = [pl.BlockSpec((1, C, T), lambda n: (n, 0, 0))]
    in_specs += [pl.BlockSpec(a.shape, lambda n, _nd=a.ndim: (0,) * _nd) for a in consts]

    out = pl.pallas_call(
        _eegnet_kernel,
        out_shape=jax.ShapeDtypeStruct((N, 1, 1), jnp.float32),
        grid=(N,),
        in_specs=in_specs,
        out_specs=pl.BlockSpec((1, 1, 1), lambda n: (n, 0, 0)),
        compiler_params=pltpu.CompilerParams(dimension_semantics=("parallel",)),
    )(xt, *consts)
    return out.reshape(N, 1)


# ----------------------------------------------------------------------------
# Parameters (deterministic synthetic init, shapes follow the PyTorch module)
# ----------------------------------------------------------------------------
def init_params(key, C, T):
    ks = jax.random.split(key, 12)

    def bn(kk, f):
        k1, k2, k3, k4 = jax.random.split(kk, 4)
        gamma = 1.0 + 0.1 * jax.random.normal(k1, (1, f))
        beta = 0.1 * jax.random.normal(k2, (1, f))
        mean = 0.1 * jax.random.normal(k3, (1, f))
        var = jax.random.uniform(k4, (1, f), minval=0.5, maxval=1.5)
        return gamma, beta, mean, var

    p = {
        "w1": 0.1 * jax.random.normal(ks[0], (16, 1, 1, C)),     # Conv2d(1,16,(1,C))
        "b1": 0.1 * jax.random.normal(ks[1], (16,)),
        "bn1": bn(ks[2], 16),
        "w2": 0.1 * jax.random.normal(ks[3], (4, 1, 2, C // 2)),  # Conv2d(1,4,(2,C//2))
        "b2": 0.1 * jax.random.normal(ks[4], (4,)),
        "bn2": bn(ks[5], 4),
        "w3": 0.1 * jax.random.normal(ks[6], (4, 4, 8, 4)),       # Conv2d(4,4,(8,4))
        "b3": 0.1 * jax.random.normal(ks[7], (4,)),
        "bn3": bn(ks[8], 4),
        "wf": 0.1 * jax.random.normal(ks[9], (1, T // 2)),        # Linear(T//2, 1)
        "bf": 0.1 * jax.random.normal(ks[10], (1,)),
    }
    return p


# ----------------------------------------------------------------------------
# Plain-JAX (XLA) reference mirroring the PyTorch module, for validation.
# ----------------------------------------------------------------------------
def eegnet_reference(x, p, C, T):
    hi = jax.lax.Precision.HIGHEST
    dn = ("NCHW", "OIHW", "NCHW")

    def bn(y, bnp):
        gamma, beta, mean, var = (a.reshape(1, -1, 1, 1) for a in bnp)
        return (y - mean) * jax.lax.rsqrt(var) * gamma + beta

    y = jax.lax.conv_general_dilated(x, p["w1"], (1, 1), "VALID",
                                     dimension_numbers=dn, precision=hi)
    y = bn(_elu(y + p["b1"].reshape(1, -1, 1, 1)), p["bn1"])
    y = jnp.transpose(y, (0, 3, 1, 2))                              # permute(0,3,1,2)
    y = jnp.pad(y, ((0, 0), (0, 0), (0, 1), (16, 17)))              # ZeroPad2d((16,17,0,1))
    y = jax.lax.conv_general_dilated(y, p["w2"], (1, 1), "VALID",
                                     dimension_numbers=dn, precision=hi)
    y = bn(_elu(y + p["b2"].reshape(1, -1, 1, 1)), p["bn2"])
    y = jax.lax.reduce_window(y, -jnp.inf, jax.lax.max,
                              (1, 1, 2, 2), (1, 1, 4, 4), "VALID")   # MaxPool2d(2, 4)
    y = jnp.pad(y, ((0, 0), (0, 0), (4, 3), (2, 1)))                 # ZeroPad2d((2,1,4,3))
    y = jax.lax.conv_general_dilated(y, p["w3"], (1, 1), "VALID",
                                     dimension_numbers=dn, precision=hi)
    y = bn(_elu(y + p["b3"].reshape(1, -1, 1, 1)), p["bn3"])
    y = jax.lax.reduce_window(y, -jnp.inf, jax.lax.max,
                              (1, 1, 2, 4), (1, 1, 2, 4), "VALID")   # MaxPool2d((2,4))
    y = y.reshape(-1, T // 2)
    z = jnp.dot(y, p["wf"].T, precision=hi) + p["bf"]
    return 1.0 / (1.0 + jnp.exp(-z))


if __name__ == "__main__":
    # Small shapes consistent with the module: the architecture requires
    # T % 16 == 0 and the final view(-1, T//2) to be batch-preserving.
    C, T, N = 48, 64, 2
    key = jax.random.PRNGKey(0)
    kx, kp = jax.random.split(key)
    x = jax.random.normal(kx, (N, 1, T, C), dtype=jnp.float32)   # NCHW like PyTorch
    params = init_params(kp, C, T)

    out = jax.block_until_ready(eegnet_forward(x, params, C, T))
    ref = jax.block_until_ready(eegnet_reference(x, params, C, T))

    assert out.shape == (N, 1), out.shape
    assert bool(jnp.all(jnp.isfinite(out)))
    assert bool(jnp.max(jnp.abs(out - ref)) < 5e-3), (out, ref)
    print("KERNEL_OK")
</pallas_src>

<mosaic_0001>
module attributes {stable_mosaic.version = 11 : i64} {
  func.func @_eegnet_kernel(%arg0: i32, %arg1: memref<1x48x64xf32, #tpu.memory_space<vmem>>, %arg2: memref<17x48xf32, #tpu.memory_space<vmem>>, %arg3: memref<3x17x1xf32, #tpu.memory_space<vmem>>, %arg4: memref<2x64x296xf32, #tpu.memory_space<vmem>>, %arg5: memref<3x1x296xf32, #tpu.memory_space<vmem>>, %arg6: memref<11x15xf32, #tpu.memory_space<vmem>>, %arg7: memref<2x296x76xf32, #tpu.memory_space<vmem>>, %arg8: memref<8x76x76xf32, #tpu.memory_space<vmem>>, %arg9: memref<3x1x76xf32, #tpu.memory_space<vmem>>, %arg10: memref<4x76x16xf32, #tpu.memory_space<vmem>>, %arg11: memref<2x16xf32, #tpu.memory_space<vmem>>, %arg12: memref<1x1xf32, #tpu.memory_space<vmem>>, %arg13: memref<1x1x1xf32, #tpu.memory_space<vmem>>) attributes {dimension_semantics = [#tpu.dimension_semantics<parallel>], iteration_bounds = array<i64: 2>, scalar_prefetch = 0 : i64, scratch_operands = 0 : i64, tpu.core_type = #tpu.core_type<tc>, window_params = [{transform_indices = @transform_0, window_bounds = array<i64: 1, 48, 64>}, {pipeline_mode = #tpu.pipeline_mode<synchronous>, transform_indices = @transform_1, window_bounds = array<i64: 17, 48>}, {pipeline_mode = #tpu.pipeline_mode<synchronous>, transform_indices = @transform_2, window_bounds = array<i64: 3, 17, 1>}, {pipeline_mode = #tpu.pipeline_mode<synchronous>, transform_indices = @transform_3, window_bounds = array<i64: 2, 64, 296>}, {pipeline_mode = #tpu.pipeline_mode<synchronous>, transform_indices = @transform_4, window_bounds = array<i64: 3, 1, 296>}, {pipeline_mode = #tpu.pipeline_mode<synchronous>, transform_indices = @transform_5, window_bounds = array<i64: 11, 15>}, {pipeline_mode = #tpu.pipeline_mode<synchronous>, transform_indices = @transform_6, window_bounds = array<i64: 2, 296, 76>}, {pipeline_mode = #tpu.pipeline_mode<synchronous>, transform_indices = @transform_7, window_bounds = array<i64: 8, 76, 76>}, {pipeline_mode = #tpu.pipeline_mode<synchronous>, transform_indices = @transform_8, window_bounds = array<i64: 3, 1, 76>}, {pipeline_mode = #tpu.pipeline_mode<synchronous>, transform_indices = @transform_9, window_bounds = array<i64: 4, 76, 16>}, {pipeline_mode = #tpu.pipeline_mode<synchronous>, transform_indices = @transform_10, window_bounds = array<i64: 2, 16>}, {pipeline_mode = #tpu.pipeline_mode<synchronous>, transform_indices = @transform_11, window_bounds = array<i64: 1, 1>}, {transform_indices = @transform_12, window_bounds = array<i64: 1, 1, 1>}]} {
    %c0 = arith.constant 0 : index
    %c0_0 = arith.constant 0 : index
    %c0_1 = arith.constant 0 : index
    %0 = vector.load %arg1[%c0, %c0_0, %c0_1] : memref<1x48x64xf32, #tpu.memory_space<vmem>>, vector<1x48x64xf32>
    %1 = vector.shape_cast %0 : vector<1x48x64xf32> to vector<48x64xf32>
    %c0_2 = arith.constant 0 : index
    %c0_3 = arith.constant 0 : index
    %2 = vector.load %arg2[%c0_2, %c0_3] : memref<17x48xf32, #tpu.memory_space<vmem>>, vector<17x48xf32>
    %cst = arith.constant dense<0.000000e+00> : vector<17x64xf32>
    %3 = tpu.matmul %2, %1, %cst {dimension_numbers = #tpu.dot_dimension_numbers<[1], [0], [0], [1], [0, 0, 1, 1], [], []>} : vector<17x48xf32>, vector<48x64xf32>, vector<17x64xf32> -> vector<17x64xf32>
    %c0_4 = arith.constant 0 : index
    %c0_5 = arith.constant 0 : index
    %c0_6 = arith.constant 0 : index
    %4 = vector.load %arg3[%c0_4, %c0_5, %c0_6] : memref<3x17x1xf32, #tpu.memory_space<vmem>>, vector<1x17x1xf32>
    %5 = vector.shape_cast %4 : vector<1x17x1xf32> to vector<17x1xf32>
    %6 = vector.broadcast %5 : vector<17x1xf32> to vector<17x64xf32>
    %7 = arith.addf %3, %6 : vector<17x64xf32>
    %cst_7 = arith.constant 0.000000e+00 : f32
    %8 = vector.broadcast %cst_7 : f32 to vector<17x64xf32>
    %9 = arith.cmpf ogt, %7, %8 : vector<17x64xf32>
    %cst_8 = arith.constant 0.000000e+00 : f32
    %10 = vector.broadcast %cst_8 : f32 to vector<17x64xf32>
    %11 = arith.minimumf %7, %10 : vector<17x64xf32>
    %12 = math.exp %11 : vector<17x64xf32>
    %cst_9 = arith.constant 1.000000e+00 : f32
    %13 = vector.broadcast %cst_9 : f32 to vector<17x64xf32>
    %14 = arith.subf %12, %13 : vector<17x64xf32>
    %15 = arith.select %9, %7, %14 : vector<17x64xi1>, vector<17x64xf32>
    %c1 = arith.constant 1 : index
    %c0_10 = arith.constant 0 : index
    %c0_11 = arith.constant 0 : index
    %16 = vector.load %arg3[%c1, %c0_10, %c0_11] : memref<3x17x1xf32, #tpu.memory_space<vmem>>, vector<1x17x1xf32>
    %17 = vector.shape_cast %16 : vector<1x17x1xf32> to vector<17x1xf32>
    %18 = vector.broadcast %17 : vector<17x1xf32> to vector<17x64xf32>
    %19 = arith.mulf %15, %18 : vector<17x64xf32>
    %c2 = arith.constant 2 : index
    %c0_12 = arith.constant 0 : index
    %c0_13 = arith.constant 0 : index
    %20 = vector.load %arg3[%c2, %c0_12, %c0_13] : memref<3x17x1xf32, #tpu.memory_space<vmem>>, vector<1x17x1xf32>
    %21 = vector.shape_cast %20 : vector<1x17x1xf32> to vector<17x1xf32>
    %22 = vector.broadcast %21 : vector<17x1xf32> to vector<17x64xf32>
    %23 = arith.addf %19, %22 : vector<17x64xf32>
    %24 = vector.extract_strided_slice %23 {offsets = [0, 0], sizes = [16, 64], strides = [1, 1]} : vector<17x64xf32> to vector<16x64xf32>
    %c0_14 = arith.constant 0 : index
    %c0_15 = arith.constant 0 : index
    %c0_16 = arith.constant 0 : index
    %25 = vector.load %arg4[%c0_14, %c0_15, %c0_16] : memref<2x64x296xf32, #tpu.memory_space<vmem>>, vector<1x64x296xf32>
    %26 = vector.shape_cast %25 : vector<1x64x296xf32> to vector<64x296xf32>
    %cst_17 = arith.constant dense<0.000000e+00> : vector<16x296xf32>
    %27 = tpu.matmul %24, %26, %cst_17 {dimension_numbers = #tpu.dot_dimension_numbers<[1], [0], [0], [1], [0, 0, 1, 1], [], []>} : vector<16x64xf32>, vector<64x296xf32>, vector<16x296xf32> -> vector<16x296xf32>
    %28 = vector.extract_strided_slice %23 {offsets = [1, 0], sizes = [16, 64], strides = [1, 1]} : vector<17x64xf32> to vector<16x64xf32>
    %c1_18 = arith.constant 1 : index
    %c0_19 = arith.constant 0 : index
    %c0_20 = arith.constant 0 : index
    %29 = vector.load %arg4[%c1_18, %c0_19, %c0_20] : memref<2x64x296xf32, #tpu.memory_space<vmem>>, vector<1x64x296xf32>
    %30 = vector.shape_cast %29 : vector<1x64x296xf32> to vector<64x296xf32>
    %cst_21 = arith.constant dense<0.000000e+00> : vector<16x296xf32>
    %31 = tpu.matmul %28, %30, %cst_21 {dimension_numbers = #tpu.dot_dimension_numbers<[1], [0], [0], [1], [0, 0, 1, 1], [], []>} : vector<16x64xf32>, vector<64x296xf32>, vector<16x296xf32> -> vector<16x296xf32>
    %32 = arith.addf %27, %31 : vector<16x296xf32>
    %c0_22 = arith.constant 0 : index
    %c0_23 = arith.constant 0 : index
    %c0_24 = arith.constant 0 : index
    %33 = vector.load %arg5[%c0_22, %c0_23, %c0_24] : memref<3x1x296xf32, #tpu.memory_space<vmem>>, vector<1x1x296xf32>
    %34 = vector.shape_cast %33 : vector<1x1x296xf32> to vector<1x296xf32>
    %35 = vector.broadcast %34 : vector<1x296xf32> to vector<16x296xf32>
    %36 = arith.addf %32, %35 : vector<16x296xf32>
    %cst_25 = arith.constant 0.000000e+00 : f32
    %37 = vector.broadcast %cst_25 : f32 to vector<16x296xf32>
    %38 = arith.cmpf ogt, %36, %37 : vector<16x296xf32>
    %cst_26 = arith.constant 0.000000e+00 : f32
    %39 = vector.broadcast %cst_26 : f32 to vector<16x296xf32>
    %40 = arith.minimumf %36, %39 : vector<16x296xf32>
    %41 = math.exp %40 : vector<16x296xf32>
    %cst_27 = arith.constant 1.000000e+00 : f32
    %42 = vector.broadcast %cst_27 : f32 to vector<16x296xf32>
    %43 = arith.subf %41, %42 : vector<16x296xf32>
    %44 = arith.select %38, %36, %43 : vector<16x296xi1>, vector<16x296xf32>
    %c1_28 = arith.constant 1 : index
    %c0_29 = arith.constant 0 : index
    %c0_30 = arith.constant 0 : index
    %45 = vector.load %arg5[%c1_28, %c0_29, %c0_30] : memref<3x1x296xf32, #tpu.memory_space<vmem>>, vector<1x1x296xf32>
    %46 = vector.shape_cast %45 : vector<1x1x296xf32> to vector<1x296xf32>
    %47 = vector.broadcast %46 : vector<1x296xf32> to vector<16x296xf32>
    %48 = arith.mulf %44, %47 : vector<16x296xf32>
    %c2_31 = arith.constant 2 : index
    %c0_32 = arith.constant 0 : index
    %c0_33 = arith.constant 0 : index
    %49 = vector.load %arg5[%c2_31, %c0_32, %c0_33] : memref<3x1x296xf32, #tpu.memory_space<vmem>>, vector<1x1x296xf32>
    %50 = vector.shape_cast %49 : vector<1x1x296xf32> to vector<1x296xf32>
    %51 = vector.broadcast %50 : vector<1x296xf32> to vector<16x296xf32>
    %52 = arith.addf %48, %51 : vector<16x296xf32>
    %53 = vector.extract_strided_slice %52 {offsets = [0, 0], sizes = [15, 296], strides = [1, 1]} : vector<16x296xf32> to vector<15x296xf32>
    %54 = vector.extract_strided_slice %52 {offsets = [1, 0], sizes = [15, 296], strides = [1, 1]} : vector<16x296xf32> to vector<15x296xf32>
    %55 = arith.maximumf %53, %54 : vector<15x296xf32>
    %c0_34 = arith.constant 0 : index
    %c0_35 = arith.constant 0 : index
    %c0_36 = arith.constant 0 : index
    %56 = vector.load %arg7[%c0_34, %c0_35, %c0_36] : memref<2x296x76xf32, #tpu.memory_space<vmem>>, vector<1x296x76xf32>
    %57 = vector.shape_cast %56 : vector<1x296x76xf32> to vector<296x76xf32>
    %cst_37 = arith.constant dense<0.000000e+00> : vector<15x76xf32>
    %58 = tpu.matmul %55, %57, %cst_37 {dimension_numbers = #tpu.dot_dimension_numbers<[1], [0], [0], [1], [0, 0, 1, 1], [], []>} : vector<15x296xf32>, vector<296x76xf32>, vector<15x76xf32> -> vector<15x76xf32>
    %c1_38 = arith.constant 1 : index
    %c0_39 = arith.constant 0 : index
    %c0_40 = arith.constant 0 : index
    %59 = vector.load %arg7[%c1_38, %c0_39, %c0_40] : memref<2x296x76xf32, #tpu.memory_space<vmem>>, vector<1x296x76xf32>
    %60 = vector.shape_cast %59 : vector<1x296x76xf32> to vector<296x76xf32>
    %cst_41 = arith.constant dense<0.000000e+00> : vector<15x76xf32>
    %61 = tpu.matmul %55, %60, %cst_41 {dimension_numbers = #tpu.dot_dimension_numbers<[1], [0], [0], [1], [0, 0, 1, 1], [], []>} : vector<15x296xf32>, vector<296x76xf32>, vector<15x76xf32> -> vector<15x76xf32>
    %62 = arith.maximumf %58, %61 : vector<15x76xf32>
    %c0_42 = arith.constant 0 : index
    %c0_43 = arith.constant 0 : index
    %63 = vector.load %arg6[%c0_42, %c0_43] : memref<11x15xf32, #tpu.memory_space<vmem>>, vector<11x15xf32>
    %cst_44 = arith.constant dense<0.000000e+00> : vector<11x76xf32>
    %64 = tpu.matmul %63, %62, %cst_44 {dimension_numbers = #tpu.dot_dimension_numbers<[1], [0], [0], [1], [0, 0, 1, 1], [], []>} : vector<11x15xf32>, vector<15x76xf32>, vector<11x76xf32> -> vector<11x76xf32>
    %c0_45 = arith.constant 0 : index
    %c0_46 = arith.constant 0 : index
    %c0_47 = arith.constant 0 : index
    %65 = vector.load %arg9[%c0_45, %c0_46, %c0_47] : memref<3x1x76xf32, #tpu.memory_space<vmem>>, vector<1x1x76xf32>
    %66 = vector.shape_cast %65 : vector<1x1x76xf32> to vector<1x76xf32>
    %67 = vector.extract_strided_slice %64 {offsets = [0, 0], sizes = [4, 76], strides = [1, 1]} : vector<11x76xf32> to vector<4x76xf32>
    %c0_48 = arith.constant 0 : index
    %c0_49 = arith.constant 0 : index
    %c0_50 = arith.constant 0 : index
    %68 = vector.load %arg8[%c0_48, %c0_49, %c0_50] : memref<8x76x76xf32, #tpu.memory_space<vmem>>, vector<1x76x76xf32>
    %69 = vector.shape_cast %68 : vector<1x76x76xf32> to vector<76x76xf32>
    %cst_51 = arith.constant dense<0.000000e+00> : vector<4x76xf32>
    %70 = tpu.matmul %67, %69, %cst_51 {dimension_numbers = #tpu.dot_dimension_numbers<[1], [0], [0], [1], [0, 0, 1, 1], [], []>} : vector<4x76xf32>, vector<76x76xf32>, vector<4x76xf32> -> vector<4x76xf32>
    %71 = vector.broadcast %66 : vector<1x76xf32> to vector<4x76xf32>
    %72 = arith.addf %71, %70 : vector<4x76xf32>
    %73 = vector.extract_strided_slice %64 {offsets = [1, 0], sizes = [4, 76], strides = [1, 1]} : vector<11x76xf32> to vector<4x76xf32>
    %c1_52 = arith.constant 1 : index
    %c0_53 = arith.constant 0 : index
    %c0_54 = arith.constant 0 : index
    %74 = vector.load %arg8[%c1_52, %c0_53, %c0_54] : memref<8x76x76xf32, #tpu.memory_space<vmem>>, vector<1x76x76xf32>
    %75 = vector.shape_cast %74 : vector<1x76x76xf32> to vector<76x76xf32>
    %cst_55 = arith.constant dense<0.000000e+00> : vector<4x76xf32>
    %76 = tpu.matmul %73, %75, %cst_55 {dimension_numbers = #tpu.dot_dimension_numbers<[1], [0], [0], [1], [0, 0, 1, 1], [], []>} : vector<4x76xf32>, vector<76x76xf32>, vector<4x76xf32> -> vector<4x76xf32>
    %77 = arith.addf %72, %76 : vector<4x76xf32>
    %78 = vector.extract_strided_slice %64 {offsets = [2, 0], sizes = [4, 76], strides = [1, 1]} : vector<11x76xf32> to vector<4x76xf32>
    %c2_56 = arith.constant 2 : index
    %c0_57 = arith.constant 0 : index
    %c0_58 = arith.constant 0 : index
    %79 = vector.load %arg8[%c2_56, %c0_57, %c0_58] : memref<8x76x76xf32, #tpu.memory_space<vmem>>, vector<1x76x76xf32>
    %80 = vector.shape_cast %79 : vector<1x76x76xf32> to vector<76x76xf32>
    %cst_59 = arith.constant dense<0.000000e+00> : vector<4x76xf32>
    %81 = tpu.matmul %78, %80, %cst_59 {dimension_numbers = #tpu.dot_dimension_numbers<[1], [0], [0], [1], [0, 0, 1, 1], [], []>} : vector<4x76xf32>, vector<76x76xf32>, vector<4x76xf32> -> vector<4x76xf32>
    %82 = arith.addf %77, %81 : vector<4x76xf32>
    %83 = vector.extract_strided_slice %64 {offsets = [3, 0], sizes = [4, 76], strides = [1, 1]} : vector<11x76xf32> to vector<4x76xf32>
    %c3 = arith.constant 3 : index
    %c0_60 = arith.constant 0 : index
    %c0_61 = arith.constant 0 : index
    %84 = vector.load %arg8[%c3, %c0_60, %c0_61] : memref<8x76x76xf32, #tpu.memory_space<vmem>>, vector<1x76x76xf32>
    %85 = vector.shape_cast %84 : vector<1x76x76xf32> to vector<76x76xf32>
    %cst_62 = arith.constant dense<0.000000e+00> : vector<4x76xf32>
    %86 = tpu.matmul %83, %85, %cst_62 {dimension_numbers = #tpu.dot_dimension_numbers<[1], [0], [0], [1], [0, 0, 1, 1], [], []>} : vector<4x76xf32>, vector<76x76xf32>, vector<4x76xf32> -> vector<4x76xf32>
    %87 = arith.addf %82, %86 : vector<4x76xf32>
    %88 = vector.extract_strided_slice %64 {offsets = [4, 0], sizes = [4, 76], strides = [1, 1]} : vector<11x76xf32> to vector<4x76xf32>
    %c4 = arith.constant 4 : index
    %c0_63 = arith.constant 0 : index
    %c0_64 = arith.constant 0 : index
    %89 = vector.load %arg8[%c4, %c0_63, %c0_64] : memref<8x76x76xf32, #tpu.memory_space<vmem>>, vector<1x76x76xf32>
    %90 = vector.shape_cast %89 : vector<1x76x76xf32> to vector<76x76xf32>
    %cst_65 = arith.constant dense<0.000000e+00> : vector<4x76xf32>
    %91 = tpu.matmul %88, %90, %cst_65 {dimension_numbers = #tpu.dot_dimension_numbers<[1], [0], [0], [1], [0, 0, 1, 1], [], []>} : vector<4x76xf32>, vector<76x76xf32>, vector<4x76xf32> -> vector<4x76xf32>
    %92 = arith.addf %87, %91 : vector<4x76xf32>
    %93 = vector.extract_strided_slice %64 {offsets = [5, 0], sizes = [4, 76], strides = [1, 1]} : vector<11x76xf32> to vector<4x76xf32>
    %c5 = arith.constant 5 : index
    %c0_66 = arith.constant 0 : index
    %c0_67 = arith.constant 0 : index
    %94 = vector.load %arg8[%c5, %c0_66, %c0_67] : memref<8x76x76xf32, #tpu.memory_space<vmem>>, vector<1x76x76xf32>
    %95 = vector.shape_cast %94 : vector<1x76x76xf32> to vector<76x76xf32>
    %cst_68 = arith.constant dense<0.000000e+00> : vector<4x76xf32>
    %96 = tpu.matmul %93, %95, %cst_68 {dimension_numbers = #tpu.dot_dimension_numbers<[1], [0], [0], [1], [0, 0, 1, 1], [], []>} : vector<4x76xf32>, vector<76x76xf32>, vector<4x76xf32> -> vector<4x76xf32>
    %97 = arith.addf %92, %96 : vector<4x76xf32>
    %98 = vector.extract_strided_slice %64 {offsets = [6, 0], sizes = [4, 76], strides = [1, 1]} : vector<11x76xf32> to vector<4x76xf32>
    %c6 = arith.constant 6 : index
    %c0_69 = arith.constant 0 : index
    %c0_70 = arith.constant 0 : index
    %99 = vector.load %arg8[%c6, %c0_69, %c0_70] : memref<8x76x76xf32, #tpu.memory_space<vmem>>, vector<1x76x76xf32>
    %100 = vector.shape_cast %99 : vector<1x76x76xf32> to vector<76x76xf32>
    %cst_71 = arith.constant dense<0.000000e+00> : vector<4x76xf32>
    %101 = tpu.matmul %98, %100, %cst_71 {dimension_numbers = #tpu.dot_dimension_numbers<[1], [0], [0], [1], [0, 0, 1, 1], [], []>} : vector<4x76xf32>, vector<76x76xf32>, vector<4x76xf32> -> vector<4x76xf32>
    %102 = arith.addf %97, %101 : vector<4x76xf32>
    %103 = vector.extract_strided_slice %64 {offsets = [7, 0], sizes = [4, 76], strides = [1, 1]} : vector<11x76xf32> to vector<4x76xf32>
    %c7 = arith.constant 7 : index
    %c0_72 = arith.constant 0 : index
    %c0_73 = arith.constant 0 : index
    %104 = vector.load %arg8[%c7, %c0_72, %c0_73] : memref<8x76x76xf32, #tpu.memory_space<vmem>>, vector<1x76x76xf32>
    %105 = vector.shape_cast %104 : vector<1x76x76xf32> to vector<76x76xf32>
    %cst_74 = arith.constant dense<0.000000e+00> : vector<4x76xf32>
    %106 = tpu.matmul %103, %105, %cst_74 {dimension_numbers = #tpu.dot_dimension_numbers<[1], [0], [0], [1], [0, 0, 1, 1], [], []>} : vector<4x76xf32>, vector<76x76xf32>, vector<4x76xf32> -> vector<4x76xf32>
    %107 = arith.addf %102, %106 : vector<4x76xf32>
    %cst_75 = arith.constant 0.000000e+00 : f32
    %108 = vector.broadcast %cst_75 : f32 to vector<4x76xf32>
    %109 = arith.cmpf ogt, %107, %108 : vector<4x76xf32>
    %cst_76 = arith.constant 0.000000e+00 : f32
    %110 = vector.broadcast %cst_76 : f32 to vector<4x76xf32>
    %111 = arith.minimumf %107, %110 : vector<4x76xf32>
    %112 = math.exp %111 : vector<4x76xf32>
    %cst_77 = arith.constant 1.000000e+00 : f32
    %113 = vector.broadcast %cst_77 : f32 to vector<4x76xf32>
    %114 = arith.subf %112, %113 : vector<4x76xf32>
    %115 = arith.select %109, %107, %114 : vector<4x76xi1>, vector<4x76xf32>
    %c1_78 = arith.constant 1 : index
    %c0_79 = arith.constant 0 : index
    %c0_80 = arith.constant 0 : index
    %116 = vector.load %arg9[%c1_78, %c0_79, %c0_80] : memref<3x1x76xf32, #tpu.memory_space<vmem>>, vector<1x1x76xf32>
    %117 = vector.shape_cast %116 : vector<1x1x76xf32> to vector<1x76xf32>
    %118 = vector.broadcast %117 : vector<1x76xf32> to vector<4x76xf32>
    %119 = arith.mulf %115, %118 : vector<4x76xf32>
    %c2_81 = arith.constant 2 : index
    %c0_82 = arith.constant 0 : index
    %c0_83 = arith.constant 0 : index
    %120 = vector.load %arg9[%c2_81, %c0_82, %c0_83] : memref<3x1x76xf32, #tpu.memory_space<vmem>>, vector<1x1x76xf32>
    %121 = vector.shape_cast %120 : vector<1x1x76xf32> to vector<1x76xf32>
    %122 = vector.broadcast %121 : vector<1x76xf32> to vector<4x76xf32>
    %123 = arith.addf %119, %122 : vector<4x76xf32>
    %124 = vector.extract_strided_slice %123 {offsets = [0, 0], sizes = [3, 76], strides = [1, 1]} : vector<4x76xf32> to vector<3x76xf32>
    %125 = vector.extract_strided_slice %123 {offsets = [1, 0], sizes = [3, 76], strides = [1, 1]} : vector<4x76xf32> to vector<3x76xf32>
    %126 = arith.maximumf %124, %125 : vector<3x76xf32>
    %c0_84 = arith.constant 0 : index
    %c0_85 = arith.constant 0 : index
    %c0_86 = arith.constant 0 : index
    %127 = vector.load %arg10[%c0_84, %c0_85, %c0_86] : memref<4x76x16xf32, #tpu.memory_space<vmem>>, vector<1x76x16xf32>
    %128 = vector.shape_cast %127 : vector<1x76x16xf32> to vector<76x16xf32>
    %cst_87 = arith.constant dense<0.000000e+00> : vector<3x16xf32>
    %129 = tpu.matmul %126, %128, %cst_87 {dimension_numbers = #tpu.dot_dimension_numbers<[1], [0], [0], [1], [0, 0, 1, 1], [], []>} : vector<3x76xf32>, vector<76x16xf32>, vector<3x16xf32> -> vector<3x16xf32>
    %c1_88 = arith.constant 1 : index
    %c0_89 = arith.constant 0 : index
    %c0_90 = arith.constant 0 : index
    %130 = vector.load %arg10[%c1_88, %c0_89, %c0_90] : memref<4x76x16xf32, #tpu.memory_space<vmem>>, vector<1x76x16xf32>
    %131 = vector.shape_cast %130 : vector<1x76x16xf32> to vector<76x16xf32>
    %cst_91 = arith.constant dense<0.000000e+00> : vector<3x16xf32>
    %132 = tpu.matmul %126, %131, %cst_91 {dimension_numbers = #tpu.dot_dimension_numbers<[1], [0], [0], [1], [0, 0, 1, 1], [], []>} : vector<3x76xf32>, vector<76x16xf32>, vector<3x16xf32> -> vector<3x16xf32>
    %133 = arith.maximumf %129, %132 : vector<3x16xf32>
    %c2_92 = arith.constant 2 : index
    %c0_93 = arith.constant 0 : index
    %c0_94 = arith.constant 0 : index
    %134 = vector.load %arg10[%c2_92, %c0_93, %c0_94] : memref<4x76x16xf32, #tpu.memory_space<vmem>>, vector<1x76x16xf32>
    %135 = vector.shape_cast %134 : vector<1x76x16xf32> to vector<76x16xf32>
    %cst_95 = arith.constant dense<0.000000e+00> : vector<3x16xf32>
    %136 = tpu.matmul %126, %135, %cst_95 {dimension_numbers = #tpu.dot_dimension_numbers<[1], [0], [0], [1], [0, 0, 1, 1], [], []>} : vector<3x76xf32>, vector<76x16xf32>, vector<3x16xf32> -> vector<3x16xf32>
    %137 = arith.maximumf %133, %136 : vector<3x16xf32>
    %c3_96 = arith.constant 3 : index
    %c0_97 = arith.constant 0 : index
    %c0_98 = arith.constant 0 : index
    %138 = vector.load %arg10[%c3_96, %c0_97, %c0_98] : memref<4x76x16xf32, #tpu.memory_space<vmem>>, vector<1x76x16xf32>
    %139 = vector.shape_cast %138 : vector<1x76x16xf32> to vector<76x16xf32>
    %cst_99 = arith.constant dense<0.000000e+00> : vector<3x16xf32>
    %140 = tpu.matmul %126, %139, %cst_99 {dimension_numbers = #tpu.dot_dimension_numbers<[1], [0], [0], [1], [0, 0, 1, 1], [], []>} : vector<3x76xf32>, vector<76x16xf32>, vector<3x16xf32> -> vector<3x16xf32>
    %141 = arith.maximumf %137, %140 : vector<3x16xf32>
    %c0_100 = arith.constant 0 : index
    %c0_101 = arith.constant 0 : index
    %142 = vector.load %arg11[%c0_100, %c0_101] : memref<2x16xf32, #tpu.memory_space<vmem>>, vector<2x16xf32>
    %143 = vector.extract_strided_slice %141 {offsets = [0, 0], sizes = [1, 16], strides = [1, 1]} : vector<3x16xf32> to vector<1x16xf32>
    %144 = vector.extract_strided_slice %142 {offsets = [0, 0], sizes = [1, 16], strides = [1, 1]} : vector<2x16xf32> to vector<1x16xf32>
    %145 = arith.mulf %143, %144 : vector<1x16xf32>
    %146 = vector.extract_strided_slice %141 {offsets = [2, 0], sizes = [1, 16], strides = [1, 1]} : vector<3x16xf32> to vector<1x16xf32>
    %147 = vector.extract_strided_slice %142 {offsets = [1, 0], sizes = [1, 16], strides = [1, 1]} : vector<2x16xf32> to vector<1x16xf32>
    %148 = arith.mulf %146, %147 : vector<1x16xf32>
    %149 = arith.addf %145, %148 : vector<1x16xf32>
    %cst_102 = arith.constant dense<0.000000e+00> : vector<1xf32>
    %150 = vector.multi_reduction <add>, %149, %cst_102 [1] : vector<1x16xf32> to vector<1xf32>
    %151 = vector.shape_cast %150 : vector<1xf32> to vector<1x1xf32>
    %c0_103 = arith.constant 0 : index
    %c0_104 = arith.constant 0 : index
    %152 = vector.load %arg12[%c0_103, %c0_104] : memref<1x1xf32, #tpu.memory_space<vmem>>, vector<1x1xf32>
    %153 = arith.addf %151, %152 : vector<1x1xf32>
    %cst_105 = arith.constant 0.000000e+00 : f32
    %154 = vector.broadcast %cst_105 : f32 to vector<1x1xf32>
    %155 = arith.subf %154, %153 : vector<1x1xf32>
    %156 = math.exp %155 : vector<1x1xf32>
    %cst_106 = arith.constant 1.000000e+00 : f32
    %157 = vector.broadcast %cst_106 : f32 to vector<1x1xf32>
    %158 = arith.addf %157, %156 : vector<1x1xf32>
    %cst_107 = arith.constant 1.000000e+00 : f32
    %159 = vector.broadcast %cst_107 : f32 to vector<1x1xf32>
    %160 = arith.divf %159, %158 : vector<1x1xf32>
    %c0_108 = arith.constant 0 : index
    %c0_109 = arith.constant 0 : index
    %c0_110 = arith.constant 0 : index
    %161 = vector.load %arg13[%c0_108, %c0_109, %c0_110] : memref<1x1x1xf32, #tpu.memory_space<vmem>>, vector<1x1x1xf32>
    %162 = vector.shape_cast %161 : vector<1x1x1xf32> to vector<1x1xf32>
    %163 = vector.shape_cast %160 : vector<1x1xf32> to vector<1x1x1xf32>
    tpu.vector_store %arg13[%c0_108, %c0_109, %c0_110], %163 {strides = array<i32>} : memref<1x1x1xf32, #tpu.memory_space<vmem>>, vector<1x1x1xf32>,
    return
  }
  func.func @transform_0(%arg0: i32) -> (i32, i32, i32) {
    %c0_i32 = arith.constant 0 : i32
    %c0_i32_0 = arith.constant 0 : i32
    %c0_i32_1 = arith.constant 0 : i32
    return %arg0, %c0_i32, %c0_i32_0 : i32, i32, i32
  }
  func.func @transform_1(%arg0: i32) -> (i32, i32) {
    %c0_i32 = arith.constant 0 : i32
    %c0_i32_0 = arith.constant 0 : i32
    %c0_i32_1 = arith.constant 0 : i32
    return %c0_i32, %c0_i32_0 : i32, i32
  }
  func.func @transform_2(%arg0: i32) -> (i32, i32, i32) {
    %c0_i32 = arith.constant 0 : i32
    %c0_i32_0 = arith.constant 0 : i32
    %c0_i32_1 = arith.constant 0 : i32
    %c0_i32_2 = arith.constant 0 : i32
    return %c0_i32, %c0_i32_0, %c0_i32_1 : i32, i32, i32
  }
  func.func @transform_3(%arg0: i32) -> (i32, i32, i32) {
    %c0_i32 = arith.constant 0 : i32
    %c0_i32_0 = arith.constant 0 : i32
    %c0_i32_1 = arith.constant 0 : i32
    %c0_i32_2 = arith.constant 0 : i32
    return %c0_i32, %c0_i32_0, %c0_i32_1 : i32, i32, i32
  }
  func.func @transform_4(%arg0: i32) -> (i32, i32, i32) {
    %c0_i32 = arith.constant 0 : i32
    %c0_i32_0 = arith.constant 0 : i32
    %c0_i32_1 = arith.constant 0 : i32
    %c0_i32_2 = arith.constant 0 : i32
    return %c0_i32, %c0_i32_0, %c0_i32_1 : i32, i32, i32
  }
  func.func @transform_5(%arg0: i32) -> (i32, i32) {
    %c0_i32 = arith.constant 0 : i32
    %c0_i32_0 = arith.constant 0 : i32
    %c0_i32_1 = arith.constant 0 : i32
    return %c0_i32, %c0_i32_0 : i32, i32
  }
  func.func @transform_6(%arg0: i32) -> (i32, i32, i32) {
    %c0_i32 = arith.constant 0 : i32
    %c0_i32_0 = arith.constant 0 : i32
    %c0_i32_1 = arith.constant 0 : i32
    %c0_i32_2 = arith.constant 0 : i32
    return %c0_i32, %c0_i32_0, %c0_i32_1 : i32, i32, i32
  }
  func.func @transform_7(%arg0: i32) -> (i32, i32, i32) {
    %c0_i32 = arith.constant 0 : i32
    %c0_i32_0 = arith.constant 0 : i32
    %c0_i32_1 = arith.constant 0 : i32
    %c0_i32_2 = arith.constant 0 : i32
    return %c0_i32, %c0_i32_0, %c0_i32_1 : i32, i32, i32
  }
  func.func @transform_8(%arg0: i32) -> (i32, i32, i32) {
    %c0_i32 = arith.constant 0 : i32
    %c0_i32_0 = arith.constant 0 : i32
    %c0_i32_1 = arith.constant 0 : i32
    %c0_i32_2 = arith.constant 0 : i32
    return %c0_i32, %c0_i32_0, %c0_i32_1 : i32, i32, i32
  }
  func.func @transform_9(%arg0: i32) -> (i32, i32, i32) {
    %c0_i32 = arith.constant 0 : i32
    %c0_i32_0 = arith.constant 0 : i32
    %c0_i32_1 = arith.constant 0 : i32
    %c0_i32_2 = arith.constant 0 : i32
    return %c0_i32, %c0_i32_0, %c0_i32_1 : i32, i32, i32
  }
  func.func @transform_10(%arg0: i32) -> (i32, i32) {
    %c0_i32 = arith.constant 0 : i32
    %c0_i32_0 = arith.constant 0 : i32
    %c0_i32_1 = arith.constant 0 : i32
    return %c0_i32, %c0_i32_0 : i32, i32
  }
  func.func @transform_11(%arg0: i32) -> (i32, i32) {
    %c0_i32 = arith.constant 0 : i32
    %c0_i32_0 = arith.constant 0 : i32
    %c0_i32_1 = arith.constant 0 : i32
    return %c0_i32, %c0_i32_0 : i32, i32
  }
  func.func @transform_12(%arg0: i32) -> (i32, i32, i32) {
    %c0_i32 = arith.constant 0 : i32
    %c0_i32_0 = arith.constant 0 : i32
    %c0_i32_1 = arith.constant 0 : i32
    return %arg0, %c0_i32, %c0_i32_0 : i32, i32, i32
  }
}

</mosaic_0001>

<bundles_post_ra>
// kernel: tpu_custom_call.1
= control target key start
LH: loop header
LB: loop body
LE: loop exit
PB: predicated region body
PF: predicated region fallthrough
CT: control target
= control target key end

     0   :  { %s4079_s23 = smov 0   ;;  %s5103_s0 = inlined_call_operand.vmem [shape: f32[2,48,64], index: 0, kind: input, shape index: {}]   ;;  %s5104_s1 = inlined_call_operand.vmem [shape: f32[17,48], index: 1, kind: input, shape index: {}]   ;;  %s5105_s2 = inlined_call_operand.vmem [shape: f32[3,17,1], index: 2, kind: input, shape index: {}]   ;;  %s5106_s3 = inlined_call_operand.vmem [shape: f32[2,64,296], index: 3, kind: input, shape index: {}]   ;;  %s5107_s4 = inlined_call_operand.vmem [shape: f32[3,1,296], index: 4, kind: input, shape index: {}]   ;;  %s5108_s5 = inlined_call_operand.vmem [shape: f32[11,15], index: 5, kind: input, shape index: {}]   ;;  %s5109_s6 = inlined_call_operand.vmem [shape: f32[2,296,76], index: 6, kind: input, shape index: {}]   ;;  %s5110_s7 = inlined_call_operand.vmem [shape: f32[8,76,76], index: 7, kind: input, shape index: {}]   ;;  %s5111_s8 = inlined_call_operand.vmem [shape: f32[3,1,76], index: 8, kind: input, shape index: {}]   ;;  %s5112_s9 = inlined_call_operand.vmem [shape: f32[4,76,16], index: 9, kind: input, shape index: {}]   ;;  %s5113_s10 = inlined_call_operand.vmem [shape: f32[2,16], index: 10, kind: input, shape index: {}]   ;;  %s5114_s11 = inlined_call_operand.<no memory space> [shape: f32[1,1], index: 11, kind: input, shape index: {}]   ;;  %s5115_s12 = inlined_call_operand.vmem [shape: f32[2,1,1], index: 12, kind: output, shape index: {}]  }
   0x1   :  { %v17_v0 = vstv %s5114_s11 }
   0x2   :  { %18 = vst [vmem:[#allocation2] sm:$0x1] %v17_v0 }
   0x3 LB: > { %s2729_s24 = sadd.s32 4294967295, %s4004_s23   ;;  %p2733_p0 = scmp.ge.s32.totalorder %s4004_s23, 1  ;;  %s4004_s23 = sphi %s4079_s23, %s24_s23  }
   0x4   : > { %p364_p1 = scmp.lt.s32.totalorder %s4004_s23, 3 }
   0x6   : > { %p365_p2 = pnand %p2733_p0, %p364_p1 }
   0x7   : > { %p404_p3 = scmp.lt.s32.totalorder (!%p365_p2), %s2729_s24, 1  ;;  %v4006_v1 = vmov (!%p365_p2), 0.0|0.0   ;;  %vm4007_vm0 = vmmov (!%p365_p2), 0   ;;  %v4008_v2 = vmov (!%p365_p2), 0.0   ;;  %v421_v3 = vld [vmem:[%s5105_s2] sm:$0xff] (!%p365_p2)  ;;  %v4009_v4 = vmov (!%p365_p2), 0  }
   0x8   : > { %368 = sbr.rel (%p365_p2) target bundleno = 1858 (0x742), region = 68  ;;  %3586 = vmatprep.subr.bf16.mxu0 (!%p365_p2), %v4006_v1  ;;  %3230 = vmatprep.mubr.msk.f32.mxu0 (!%p365_p2), %vm4007_vm0, %v4008_v2  ;;  %v423_v5 = vld [vmem:[%s5105_s2 + $0x10] sm:$0x1] (!%p365_p2)  ;;  %v422_v6 = vld [vmem:[%s5105_s2 + $0x8] sm:$0xff] (!%p365_p2)  ;;  %v2741_v7 = vld [vmem:[%s5105_s2 + $0x18] sm:$0xff] (!%p365_p2)  ;;  %vm439_vm1 = vcmask (!%p365_p2), 392192  }
   0x9   : > { %3972 = vset.pattern.permute.xlu0 (!%p365_p2), %v4009_v4  ;;  %3973 = vset.pattern.permute.xlu1 (!%p365_p2), %v4009_v4  ;;  %v2742_v13 = vld [vmem:[%s5105_s2 + $0x20] sm:$0xff] (!%p365_p2)  ;;  %v2744_v14 = vld [vmem:[%s5105_s2 + $0x30] sm:$0xff] (!%p365_p2)  ;;  %v2745_v18 = vld [vmem:[%s5105_s2 + $0x38] sm:$0xff] (!%p365_p2)  ;;  %vm643_vm5 = vcmask (!%p365_p2), 1046528   ;;  %vm649_vm6 = vcmask (!%p365_p2), 523264   ;;  %vm1133_vm13 = vcmask (!%p365_p2), 326656  }
   0xa   : > { %426 = vperm.xlu0 (!%p365_p2), %3972, %v421_v3   ;;  %718 = vmatprep.mubr.f32.mxu1 (!%p365_p2), %v4008_v2  ;;  %v2743_v19 = vld [vmem:[%s5105_s2 + $0x28] sm:$0x1] (!%p365_p2)  ;;  %v2746_v21 = vld [vmem:[%s5105_s2 + $0x40] sm:$0x1] (!%p365_p2)  ;;  %v420_v24 = vld [vmem:[%s5104_s1 + $0x10] sm:$0x1] (!%p365_p2) }
   0xb   : > { %436 = vperm.xlu1 (!%p365_p2), %3973, %v423_v5   ;;  %v418_v22 = vld [vmem:[%s5104_s1] sm:$0xff] (!%p365_p2)  ;;  %v419_v23 = vld [vmem:[%s5104_s1 + $0x8] sm:$0xff] (!%p365_p2)  ;;  %v2750_v29 = vld [vmem:[%s5106_s3 + $0xd8] sm:$0xff] (!%p365_p2)  ;;  %vm1482_vm14 = vcmask (!%p365_p2), 121856   ;;  %vm4010_vm15 = vmmov (!%p365_p2), 1  }
   0xc   : > { %v2748_v25 = vld [vmem:[%s5106_s3 + $0xc8] sm:$0xff] (!%p365_p2)  ;;  %v2751_v26 = vld [vmem:[%s5106_s3 + $0xe0] sm:$0xff] (!%p365_p2)  ;;  %v2754_v31 = vld [vmem:[%s5106_s3 + $0xf8] sm:$0xff] (!%p365_p2) }
   0xd   : > { %v3595_v27 = vpack.c.bf16 (!%p365_p2), %v2751_v26, %v2748_v25  ;;  %v2747_v28 = vld [vmem:[%s5106_s3 + $0xc0] sm:$0xff] (!%p365_p2)  ;;  %v2757_v32 = vld [vmem:[%s5106_s3 + $0x110] sm:$0xff] (!%p365_p2)  ;;  %v2752_v35 = vld [vmem:[%s5106_s3 + $0xe8] sm:$0xff] (!%p365_p2) }
   0xe   : > { %431 = vperm.xlu0 (!%p365_p2), %3972, %v422_v6   ;;  %v3597_v30 = vpack.c.bf16 (!%p365_p2), %v2750_v29, %v2747_v28  ;;  %v2749_v33 = vld [vmem:[%s5106_s3 + $0xd0] sm:$0xff] (!%p365_p2)  ;;  %v3599_v34 = vpack.c.bf16 (!%p365_p2), %v2757_v32, %v2754_v31  ;;  %v2756_v37 = vld [vmem:[%s5106_s3 + $0x108] sm:$0xff] (!%p365_p2)  ;;  %v2763_v41 = vld [vmem:[%s5106_s3 + $0x140] sm:$0xff] (!%p365_p2) }
   0xf   : > { %s5119_s24 = smov (!%p404_p3, %s2729_s24), 1  ;;  %553 = vperm.xlu1 %3973, %v2741_v7   ;;  %3596 = vmatprep.subr.bf16.mxu1 %v3595_v27  ;;  %v2753_v36 = vld [vmem:[%s5106_s3 + $0xf0] sm:$0xff]  ;;  %v3611_v38 = vpack.c.bf16 %v2752_v35, %v2749_v33  ;;  %v2760_v40 = vld [vmem:[%s5106_s3 + $0x128] sm:$0xff]  ;;  %v2755_v42 = vld [vmem:[%s5106_s3 + $0x100] sm:$0xff] }
  0x10   : > { %s3958_s28 = smul.u32 48, %s5119_s24  ;;  %3598 = vmatpush1.bf16.msra.mxu1 %v3597_v30  ;;  %v3601_v39 = vpack.c.bf16 %v2756_v37, %v2753_v36  ;;  %v3603_v43 = vpack.c.bf16 %v2763_v41, %v2760_v40  ;;  %v2758_v44 = vld [vmem:[%s5106_s3 + $0x118] sm:$0xff]  ;;  %v2759_v45 = vld [vmem:[%s5106_s3 + $0x120] sm:$0xff]  ;;  %v2769_v50 = vld [vmem:[%s5106_s3 + $0x170] sm:$0xff]  ;;  %s411_s29 = scalar_lea.vmem %s5115_s12, %s5119_s24 }
  0x11   : > { %3600 = vmatprep.subr.bf16.mxu1 %v3599_v34  ;;  %v2762_v46 = vld [vmem:[%s5106_s3 + $0x138] sm:$0xff]  ;;  %v3615_v47 = vpack.c.bf16 %v2758_v44, %v2755_v42  ;;  %v2761_v51 = vld [vmem:[%s5106_s3 + $0x130] sm:$0xff]  ;;  %v2764_v53 = vld [vmem:[%s5106_s3 + $0x148] sm:$0xff] }
  0x12   : > { %s408_s17 = scalar_lea.vmem %s5103_s0, %s3958_s28  ;;  %558 = vperm.xlu0 %3972, %v2742_v13   ;;  %v3605_v48 = vpack.c.bf16 %v2762_v46, %v2759_v45  ;;  %v2766_v49 = vld [vmem:[%s5106_s3 + $0x158] sm:$0xff]  ;;  %v2765_v54 = vld [vmem:[%s5106_s3 + $0x150] sm:$0xff]  ;;  %v2768_v55 = vld [vmem:[%s5106_s3 + $0x168] sm:$0xff]  ;;  %v3619_v56 = vpack.c.bf16 %v2764_v53, %v2761_v51 }
  0x13   : > { %v412_v8 = vld [vmem:[%s408_s17] sm:$0xff]  ;;  %v413_v9 = vld [vmem:[%s408_s17 + $0x8] sm:$0xff]  ;;  %v414_v10 = vld [vmem:[%s408_s17 + $0x10] sm:$0xff]  ;;  %575 = vperm.xlu1 %3973, %v2744_v14   ;;  %v3607_v52 = vpack.c.bf16 %v2769_v50, %v2766_v49  ;;  %v3609_v57 = vpack.c.bf16 %v2768_v55, %v2765_v54 }
  0x14   : > { %v3587_v11 = vpack.c.bf16 %v413_v9, %v412_v8  ;;  %v415_v12 = vld [vmem:[%s408_s17 + $0x18] sm:$0xff]  ;;  %v416_v16 = vld [vmem:[%s408_s17 + $0x20] sm:$0xff]  ;;  %v417_v17 = vld [vmem:[%s408_s17 + $0x28] sm:$0xff]  ;;  %3602 = vmatpush1.bf16.msra.mxu1 %v3601_v39 }
  0x15   : > { %v3590_v15 = vpack.c.bf16 %v415_v12, %v414_v10  ;;  %v3593_v20 = vpack.c.bf16 %v417_v17, %v416_v16  ;;  %3604 = vmatprep.subr.bf16.mxu1 %v3603_v43  ;;  %v2767_v58 = vld [vmem:[%s5106_s3 + $0x160] sm:$0xff]  ;;  %v2770_v59 = vld [vmem:[%s5106_s3 + $0x178] sm:$0xff]  ;;  %v592_v60 = vld [vmem:[%s5106_s3 + $0x8] sm:$0xff] }
  0x16   : > { %3588 = vmatpush3.bf16.msra.mxu0 %v3587_v11  ;;  %580 = vperm.xlu0 %3972, %v2745_v18   ;;  %v3623_v61 = vpack.c.bf16 %v2770_v59, %v2767_v58  ;;  %v595_v62 = vld [vmem:[%s5106_s3 + $0x20] sm:$0xff]  ;;  %v593_v0 = vld [vmem:[%s5106_s3 + $0x10] sm:$0xff]  ;;  %v596_v3 = vld [vmem:[%s5106_s3 + $0x28] sm:$0xff] }
  0x17   : > { %3589 = vmatprep.subr.bf16.mxu0 %v4006_v1  ;;  %563 = vperm.xlu1 %3973, %v2743_v19   ;;  %v3627_v63 = vpack.c.bf16 %v595_v62, %v592_v60  ;;  %v4223_v4 = vpack.c.bf16 %v596_v3, %v593_v0  ;;  %v591_v37 = vld [vmem:[%s5106_s3] sm:$0xff]  ;;  %v598_v41 = vld [vmem:[%s5106_s3 + $0x38] sm:$0xff]  ;;  %v601_v42 = vld [vmem:[%s5106_s3 + $0x50] sm:$0xff] }
  0x18   : > { %3606 = vmatpush1.bf16.msra.mxu1 %v3605_v48  ;;  %v3631_v50 = vpack.c.bf16 %v601_v42, %v598_v41  ;;  %v597_v51 = vld [vmem:[%s5106_s3 + $0x30] sm:$0xff]  ;;  %v604_v55 = vld [vmem:[%s5106_s3 + $0x68] sm:$0xff]  ;;  %v602_v58 = vld [vmem:[%s5106_s3 + $0x58] sm:$0xff] }
  0x19   : > { %3608 = vmatprep.subr.bf16.mxu1 %v3607_v52  ;;  %v600_v52 = vld [vmem:[%s5106_s3 + $0x48] sm:$0xff]  ;;  %v603_v62 = vld [vmem:[%s5106_s3 + $0x60] sm:$0xff]  ;;  %v610_v0 = vld [vmem:[%s5106_s3 + $0x98] sm:$0xff] }
  0x1a   : > { %3591 = vmatpush3.bf16.msra.mxu0 %v3590_v15  ;;  %585 = vperm.xlu0 %3972, %v2746_v21   ;;  %v3633_v60 = vpack.c.bf16 %v600_v52, %v597_v51  ;;  %v1120_v41 = vld [vmem:[%s5109_s6 + $0xc0] sm:$0xff]  ;;  %v1121_v42 = vld [vmem:[%s5109_s6 + $0xc8] sm:$0xff]  ;;  %v1107_v51 = vld [vmem:[%s5109_s6 + $0x58] sm:$0xff] }
  0x1b   : > { %3592 = vmatprep.subr.bf16.mxu0 %v4006_v1 }
  0x1c   : > { %3610 = vmatpush1.bf16.msra.mxu1 %v3609_v57  ;;  %v599_v57 = vld [vmem:[%s5106_s3 + $0x40] sm:$0xff] }
  0x1d   : > { %3628 = vmatprep.subr.bf16.mxu1 %v3627_v63  ;;  %v606_v63 = vld [vmem:[%s5106_s3 + $0x78] sm:$0xff] }
  0x1e   : > { %3594 = vmatpush3.bf16.msra.mxu0 %v3593_v20 }
  0x1f   : > { %3612 = vmatprep.subr.bf16.mxu0 %v3611_v38 }
  0x21   : > { %3231 = vmatmul.mubr.msk.f32.vlgmr.msra.gmra.mrb[0].mxu0 %vm439_vm1, %v418_v22 }
  0x22   : > { %3233 = vmatprep.mubr.msk.f32.mxu0 %vm4007_vm0, %v4008_v2  ;;  %3614 = vmatpush3.bf16.msra.mxu0 %v3611_v38  ;;  %v594_v38 = vld [vmem:[%s5106_s3 + $0x18] sm:$0xff] }
  0x23   : > { %3616 = vmatprep.subr.bf16.mxu0 %v3615_v47  ;;  %v3629_v45 = vpack.c.bf16 %v594_v38, %v591_v37  ;;  %v1102_v38 = vld [vmem:[%s5109_s6 + $0x30] sm:$0xff] }
  0x25   : > { %3234 = vmatmul.mubr.msk.f32.gmra.mrb[2].mxu0 %vm439_vm1, %v419_v23 }
  0x26   : > { %3236 = vmatprep.mubr.msk.f32.mxu0 %vm4007_vm0, %v4008_v2  ;;  %3618 = vmatpush3.bf16.msra.mxu0 %v3615_v47 }
  0x27   : > { %3620 = vmatprep.subr.bf16.mxu0 %v3619_v56 }
  0x29   : > { %3237 = vmatmul.mubr.msk.f32.gmra.mrb[4].mxu0 %vm439_vm1, %v420_v24  ;;  %vm3740_vm1 = vmpackc.low %vm643_vm5, %vm4010_vm15 }
  0x2a   : > { %3622 = vmatpush3.bf16.msra.mxu0 %v3619_v56  ;;  %v607_v56 = vld [vmem:[%s5106_s3 + $0x80] sm:$0xff] }
  0x2b   : > { %3624 = vmatprep.subr.bf16.mxu0 %v3623_v61 }
  0x2e   : > { %3626 = vmatpush3.bf16.msra.mxu0 %v3623_v61  ;;  %v3635_v61 = vpack.c.bf16 %v607_v56, %v604_v55  ;;  %v1124_v56 = vld [vmem:[%s5109_s6 + $0xe0] sm:$0xff] }
  0x2f   : > { %3644 = vmatprep.subr.bf16.mxu0 %v4223_v4 }
  0x89   : > { %v427_v5 = vpop.permute.xlu0 %426 }
  0x8a   : > { %v437_v16 = vpop.permute.xlu1 %436 }
  0x8d   : > { %v432_v10 = vpop.permute.xlu0 %431 }
  0x8e   : > { %v554_v23 = vpop.permute.xlu1 %553 }
  0x91   : > { %v559_v25 = vpop.permute.xlu0 %558 }
  0x92   : > { %v576_v31 = vpop.permute.xlu1 %575 }
  0x95   : > { %v581_v32 = vpop.permute.xlu0 %580 }
  0x96   : > { %v564_v43 = vpop.permute.xlu1 %563 }
  0x99   : > { %v586_v49 = vpop.permute.xlu0 %585 }
  0xf4   : > { %v515_v6 = vpop.f32.mrb[0].mxu0 }
  0xf5   : > { %v516_v7 = vadd.f32 %v515_v6, %v427_v5  ;;  %v3232_v8 = vpop.f32.mrb[1].mxu0  ;;  %v3647_v5 = vpack.c.bf16 %v602_v58, %v599_v57  ;;  %v613_v6 = vld [vmem:[%s5106_s3 + $0xb0] sm:$0xff]  ;;  %v1125_v57 = vld [vmem:[%s5109_s6 + $0xe8] sm:$0xff] }
  0xf6   : > { %v608_v8 = vld [vmem:[%s5106_s3 + $0x88] sm:$0xff]  ;;  %v3683_v58 = vpack.c.bf16 %v1125_v57, %v1124_v56 }
  0xf7   : > { %v532_v9 = vmin.f32 %v516_v7, 0.0  ;;  %vm529_vm2 = vcmp.gt.f32.partialorder %v516_v7, 0.0 }
  0xf8   : > { %v520_v11 = vpop.f32.mrb[2].mxu0 }
  0xf9   : > { %v535_v12 = vmul.f32 1.442695, %v532_v9  ;;  %v521_v13 = vadd.f32 %v520_v11, %v432_v10  ;;  %v3235_v14 = vpop.f32.mrb[3].mxu0  ;;  %v3637_v9 = vpack.c.bf16 %v606_v63, %v603_v62  ;;  %v3639_v10 = vpack.c.bf16 %v613_v6, %v610_v0  ;;  %v2823_v62 = vld [vmem:[%s5109_s6 + $0x238] sm:$0xff]  ;;  %v2824_v63 = vld [vmem:[%s5109_s6 + $0x240] sm:$0xff] }
  0xfa   : > { %v614_v14 = vld [vmem:[%s5106_s3 + $0xb8] sm:$0xff]  ;;  %v3735_v0 = vpack.c.bf16 %v2824_v63, %v2823_v62 }
  0xfb   : > { %3974 = vpow2.f32 %v535_v12  ;;  %v533_v15 = vmin.f32 %v521_v13, 0.0  ;;  %vm530_vm3 = vcmp.gt.f32.partialorder %v521_v13, 0.0  ;;  %v609_v12 = vld [vmem:[%s5106_s3 + $0x90] sm:$0xff] }
  0xfc   : > { %v525_v17 = vpop.f32.mrb[4].mxu0 }
  0xfd   : > { %v537_v18 = vmul.f32 1.442695, %v533_v15  ;;  %v526_v19 = vadd.f32 %v525_v17, %v437_v16  ;;  %v3238_v20 = vpop.f32.mrb[5].mxu0  ;;  %v1112_v17 = vld [vmem:[%s5109_s6 + $0x80] sm:$0xff] }
  0xfe   : > { %v1096_v20 = vld [vmem:[%s5109_s6] sm:$0xff] }
  0xff   : > { %3976 = vpow2.f32 %v537_v18  ;;  %v534_v21 = vmin.f32 %v526_v19, 0.0  ;;  %vm531_vm4 = vcmp.gt.f32.partialorder %v526_v19, 0.0  ;;  %v1113_v18 = vld [vmem:[%s5109_s6 + $0x88] sm:$0xff] }
 0x101   : > { %v539_v22 = vmul.f32 1.442695, %v534_v21  ;;  %v1097_v21 = vld [vmem:[%s5109_s6 + $0x8] sm:$0xff] }
 0x103   : > { %3978 = vpow2.f32 %v539_v22  ;;  %v3661_v22 = vpack.c.bf16 %v1097_v21, %v1096_v20 }
 0x105   : > { %v3975_v24 = vpop.eup %3974 }
 0x106   : > { %v2738_v26 = vadd.f32 -1.0, %v3975_v24  ;;  %v1115_v24 = vld [vmem:[%s5109_s6 + $0x98] sm:$0xff] }
 0x108   : > { %v544_v27 = vsel %vm529_vm2, %v516_v7, %v2738_v26  ;;  %v605_v7 = vld [vmem:[%s5106_s3 + $0x70] sm:$0xff]  ;;  %vm1582_vm2 = vcmask 1043456  }
 0x109   : > { %v3977_v28 = vpop.eup %3976  ;;  %v566_v29 = vmul.f32 %v554_v23, %v544_v27  ;;  %v3651_v11 = vpack.c.bf16 %v608_v8, %v605_v7  ;;  %v1114_v23 = vld [vmem:[%s5109_s6 + $0x90] sm:$0xff]  ;;  %v1099_v27 = vld [vmem:[%s5109_s6 + $0x18] sm:$0xff] }
 0x10a   : > { %v2739_v30 = vadd.f32 -1.0, %v3977_v28  ;;  %v1098_v26 = vld [vmem:[%s5109_s6 + $0x10] sm:$0xff]  ;;  %v1111_v8 = vld [vmem:[%s5109_s6 + $0x78] sm:$0xff] }
 0x10b   : > { %v4226_v36 = vadd.f32 %v576_v31, %v566_v29  ;;  %v3665_v28 = vpack.c.bf16 %v1099_v27, %v1098_v26  ;;  %v1116_v29 = vld [vmem:[%s5109_s6 + $0xa0] sm:$0xff]  ;;  %v1110_v7 = vld [vmem:[%s5109_s6 + $0x70] sm:$0xff] }
 0x10c   : > { %v545_v33 = vsel %vm530_vm3, %v521_v13, %v2739_v30  ;;  %v612_v13 = vld [vmem:[%s5106_s3 + $0xa8] sm:$0xff]  ;;  %vm4614_vm3 = vmpackc.low %vm1582_vm2, %vm4010_vm15 }
 0x10d   : > { %v3979_v34 = vpop.eup %3978  ;;  %v567_v35 = vmul.f32 %v559_v25, %v545_v33  ;;  %v644_v46 = vrot.slane %v4226_v36, 1  ;;  %v3641_v15 = vpack.c.bf16 %v612_v13, %v609_v12  ;;  %v3663_v25 = vpack.c.bf16 %v1115_v24, %v1114_v23  ;;  %v1117_v30 = vld [vmem:[%s5109_s6 + $0xa8] sm:$0xff] }
 0x10e   : > { %v2740_v39 = vadd.f32 -1.0, %v3979_v34  ;;  %v3667_v31 = vpack.c.bf16 %v1117_v30, %v1116_v29  ;;  %v1101_v33 = vld [vmem:[%s5109_s6 + $0x28] sm:$0xff] }
 0x10f   : > { %v4234_v40 = vadd.f32 %v581_v32, %v567_v35  ;;  %v1100_v32 = vld [vmem:[%s5109_s6 + $0x20] sm:$0xff]  ;;  %v1118_v35 = vld [vmem:[%s5109_s6 + $0xb0] sm:$0xff]  ;;  %v1129_v12 = vld [vmem:[%s5109_s6 + $0x108] sm:$0xff] }
 0x110   : > { %v546_v44 = vsel %vm531_vm4, %v526_v19, %v2740_v39  ;;  %v3659_v19 = vpack.c.bf16 %v1113_v18, %v1112_v17  ;;  %v3669_v34 = vpack.c.bf16 %v1101_v33, %v1100_v32  ;;  %v1103_v39 = vld [vmem:[%s5109_s6 + $0x38] sm:$0xff]  ;;  %vm1578_vm4 = vcmask 621568  }
 0x111   : > { %v568_v47 = vmul.f32 %v564_v43, %v546_v44  ;;  %v645_v48 = vrot.slane %v4234_v40, 1  ;;  %v3675_v43 = vpack.c.bf16 %v1121_v42, %v1120_v41  ;;  %v1104_v44 = vld [vmem:[%s5109_s6 + $0x40] sm:$0xff] }
 0x113   : > { %v590_v53 = vadd.f32 %v586_v49, %v568_v47  ;;  %v646_v54 = vsel %vm643_vm5, %v644_v46, %v645_v48  ;;  %v1122_v47 = vld [vmem:[%s5109_s6 + $0xd0] sm:$0xff] }
 0x114   : > { %2771 = vmatmul.mubr.msk.f32.vlgmr.msra.gmra.mrb[0].mxu1 %vm649_vm6, %v646_v54  ;;  %3255 = vmatprep.mubr.msk.f32.mxu0 %vm649_vm6, %v646_v54  ;;  %v2822_v54 = vld [vmem:[%s5109_s6 + $0x230] sm:$0xff] }
 0x115   : > { %v647_v59 = vrot.slane %v590_v53, 1  ;;  %3630 = vmatpush1.bf16.msra.mxu1 %v3629_v45  ;;  %724 = vmatprep.mubr.f32.mxu1 %v4008_v2  ;;  %v1105_v45 = vld [vmem:[%s5109_s6 + $0x48] sm:$0xff] }
 0x116   : > { %3632 = vmatprep.subr.bf16.mxu1 %v3631_v50  ;;  %v3677_v46 = vpack.c.bf16 %v1105_v45, %v1104_v44  ;;  %v1106_v50 = vld [vmem:[%s5109_s6 + $0x50] sm:$0xff]  ;;  %v2821_v53 = vld [vmem:[%s5109_s6 + $0x228] sm:$0xff] }
 0x117   : > { %v648_v3 = vsel %vm643_vm5, %v645_v48, %v647_v59  ;;  %v1123_v48 = vld [vmem:[%s5109_s6 + $0xd8] sm:$0xff]  ;;  %v3681_v52 = vpack.c.bf16 %v1107_v51, %v1106_v50  ;;  %v3731_v55 = vpack.c.bf16 %v2822_v54, %v2821_v53  ;;  %v1108_v59 = vld [vmem:[%s5109_s6 + $0x60] sm:$0xff] }
 0x118   : > { %2772 = vmatmul.mubr.msk.f32.gmra.mrb[2].mxu1 %vm649_vm6, %v648_v3  ;;  %3256 = vmatmul.mubr.msk.f32.vlgmr.msra.gmra.mrb[6].mxu0 %vm649_vm6, %v648_v3  ;;  %v3679_v49 = vpack.c.bf16 %v1123_v48, %v1122_v47  ;;  %v1126_v3 = vld [vmem:[%s5109_s6 + $0xf0] sm:$0xff]  ;;  %v2786_v51 = vld [vmem:[%s5107_s4 + $0x6] sm:$0x7] }
 0x119   : > { %3634 = vmatpush1.bf16.msra.mxu1 %v3633_v60  ;;  %3646 = vmatpush3.bf16.msra.mxu0 %v4223_v4  ;;  %v611_v4 = vld [vmem:[%s5106_s3 + $0xa0] sm:$0xff]  ;;  %v1109_v60 = vld [vmem:[%s5109_s6 + $0x68] sm:$0xff] }
 0x11a   : > { %3274 = vmatprep.mubr.msk.f32.mxu0 %vm649_vm6, %v4226_v36  ;;  %3636 = vmatprep.subr.bf16.mxu1 %v3635_v61  ;;  %v3655_v16 = vpack.c.bf16 %v614_v14, %v611_v4  ;;  %v3685_v61 = vpack.c.bf16 %v1109_v60, %v1108_v59  ;;  %v964_v4 = vlaneseq }
 0x11b   : > { %3648 = vmatprep.subr.bf16.mxu0 %v3647_v5  ;;  %874 = vmatprep.mubr.f32.mxu1 %v4008_v2 }
 0x11c   : > { %v965_v14 = vshrl.u32 %v964_v4, 7 }
 0x11d   : > { %3638 = vmatpush1.bf16.msra.mxu1 %v3637_v9  ;;  %3650 = vmatpush3.bf16.msra.mxu0 %v3647_v5  ;;  %v1127_v5 = vld [vmem:[%s5109_s6 + $0xf8] sm:$0xff]  ;;  %v3689_v9 = vpack.c.bf16 %v1111_v8, %v1110_v7 }
 0x11e   : > { %3640 = vmatprep.subr.bf16.mxu1 %v3639_v10  ;;  %3652 = vmatprep.subr.bf16.mxu0 %v3651_v11  ;;  %v3687_v6 = vpack.c.bf16 %v1127_v5, %v1126_v3  ;;  %v2825_v10 = vld [vmem:[%s5109_s6 + $0x248] sm:$0xff]  ;;  %v970_v17 = vsub.s32 1, %v965_v14 }
 0x120   : > { %v1055_v62 = vrot.slane %v2786_v51, %v970_v17 }
 0x121   : > { %3642 = vmatpush1.bf16.msra.mxu1 %v3641_v15  ;;  %3654 = vmatpush3.bf16.msra.mxu0 %v3651_v11  ;;  %v1128_v11 = vld [vmem:[%s5109_s6 + $0x100] sm:$0xff]  ;;  %v966_v15 = vsub.s32 0, %v965_v14 }
 0x122   : > { %3656 = vmatprep.subr.bf16.mxu0 %v3655_v16  ;;  %3732 = vmatprep.subr.bf16.mxu1 %v3731_v55  ;;  %v4427_v13 = vpack.c.bf16 %v1129_v12, %v1128_v11 }
 0x123   : > { %v1051_v57 = vrot.slane %v2786_v51, %v966_v15 }
 0x124   : > { %2775 = vmatmul.mubr.msk.f32.vlgmr.msra.gmra.mrb[0].mxu1 %vm649_vm6, %v4226_v36  ;;  %v1119_v36 = vld [vmem:[%s5109_s6 + $0xb8] sm:$0xff] }
 0x125   : > { %3658 = vmatpush3.bf16.msra.mxu0 %v3655_v16  ;;  %880 = vmatprep.mubr.f32.mxu1 %v4008_v2  ;;  %v3671_v37 = vpack.c.bf16 %v1119_v36, %v1118_v35  ;;  %v962_v16 = vld [vmem:[%s5107_s4] sm:$0x7] }
 0x126   : > { %3660 = vmatprep.subr.bf16.mxu0 %v3659_v19  ;;  %3734 = vmatpush3.bf16.msra.mxu1 %v3731_v55  ;;  %v967_v18 = vrot.slane %v962_v16, %v966_v15  ;;  %v974_v19 = vsub.s32 2, %v965_v14  ;;  %v971_v20 = vrot.slane %v962_v16, %v970_v17 }
 0x127   : > { %3736 = vmatprep.subr.bf16.mxu1 %v3735_v0 }
 0x128   : > { %2776 = vmatmul.mubr.msk.f32.gmra.mrb[2].mxu1 %vm649_vm6, %v4234_v40  ;;  %3275 = vmatmul.mubr.msk.f32.vlgmr.msra.gmra.mrb[6].mxu0 %vm649_vm6, %v4234_v40  ;;  %v3673_v40 = vpack.c.bf16 %v1103_v39, %v1102_v38  ;;  %v975_v24 = vrot.slane %v962_v16, %v974_v19  ;;  %v1059_v5 = vrot.slane %v2786_v51, %v974_v19  ;;  %v2792_v51 = vld [vmem:[%s5109_s6 + $0x140] sm:$0xff]  ;;  %vm2118_vm6 = vcmask 1041408  }
 0x129   : > { %3662 = vmatpush3.bf16.msra.mxu0 %v3661_v22 }
 0x12a   : > { %3664 = vmatprep.subr.bf16.mxu0 %v3663_v25  ;;  %3738 = vmatpush3.bf16.msra.mxu1 %v3735_v0 }
 0x12b   : > { %3298 = vmatprep.subr.mxu1 %v2825_v10 }
 0x12d   : > { %3666 = vmatpush3.bf16.msra.mxu0 %v3665_v28 }
 0x12e   : > { %3668 = vmatprep.subr.bf16.mxu0 %v3667_v31  ;;  %3299 = vmatpush3.msra.mxu1 %v2825_v10 }
 0x131   : > { %3670 = vmatpush3.bf16.msra.mxu0 %v3669_v34 }
 0x132   : > { %3672 = vmatprep.subr.bf16.mxu0 %v3671_v37 }
 0x135   : > { %3674 = vmatpush3.bf16.msra.mxu0 %v3673_v40 }
 0x136   : > { %3676 = vmatprep.subr.bf16.mxu0 %v3675_v43 }
 0x139   : > { %3678 = vmatpush3.bf16.msra.mxu0 %v3677_v46  ;;  %v2785_v46 = vld [vmem:[%s5107_s4 + $0x3] sm:$0x7] }
 0x13a   : > { %3680 = vmatprep.subr.bf16.mxu0 %v3679_v49  ;;  %v1027_v48 = vrot.slane %v2785_v46, %v966_v15  ;;  %v1031_v53 = vrot.slane %v2785_v46, %v970_v17 }
 0x13d   : > { %3682 = vmatpush3.bf16.msra.mxu0 %v3681_v52 }
 0x13e   : > { %3684 = vmatprep.subr.bf16.mxu0 %v3683_v58 }
 0x141   : > { %3686 = vmatpush3.bf16.msra.mxu0 %v3685_v61  ;;  %v1035_v61 = vrot.slane %v2785_v46, %v974_v19  ;;  %v2808_v46 = vld [vmem:[%s5109_s6 + $0x1c0] sm:$0xff] }
 0x142   : > { %3688 = vmatprep.subr.bf16.mxu0 %v3687_v6 }
 0x145   : > { %3690 = vmatpush3.bf16.msra.mxu0 %v3689_v9 }
 0x146   : > { %3692 = vmatprep.subr.bf16.mxu0 %v4427_v13 }
 0x1f7   : > { %v876_v21 = vpop.f32.mrb[0].mxu1 }
 0x1f8   : > { %v979_v22 = vadd.f32 %v967_v18, %v876_v21  ;;  %v878_v23 = vpop.f32.mrb[1].mxu1 }
 0x1f9   : > { %v980_v25 = vadd.f32 %v971_v20, %v878_v23 }
 0x1fa   : > { %v991_v26 = vmin.f32 %v979_v22, 0.0  ;;  %vm985_vm7 = vcmp.gt.f32.partialorder %v979_v22, 0.0 }
 0x1fb   : > { %v992_v27 = vmin.f32 %v980_v25, 0.0  ;;  %v882_v28 = vpop.f32.mrb[2].mxu1  ;;  %v3276_v29 = vpop.f32.mrb[6].mxu0  ;;  %vm986_vm8 = vcmp.gt.f32.partialorder %v980_v25, 0.0 }
 0x1fc   : > { %v997_v30 = vmul.f32 1.442695, %v991_v26  ;;  %v982_v31 = vadd.f32 %v967_v18, %v882_v28  ;;  %v984_v32 = vadd.f32 %v3276_v29, %v975_v24  ;;  %v884_v33 = vpop.f32.mrb[3].mxu1  ;;  %v953_v34 = vpop.f32.mrb[7].mxu0 }
 0x1fd   : > { %v999_v35 = vmul.f32 1.442695, %v992_v27  ;;  %v983_v36 = vadd.f32 %v971_v20, %v884_v33  ;;  %v981_v37 = vadd.f32 %v975_v24, %v953_v34 }
 0x1fe   : > { %3980 = vpow2.f32 %v997_v30  ;;  %v994_v38 = vmin.f32 %v982_v31, 0.0  ;;  %v996_v39 = vmin.f32 %v984_v32, 0.0  ;;  %vm988_vm9 = vcmp.gt.f32.partialorder %v982_v31, 0.0 }
 0x1ff   : > { %3982 = vpow2.f32 %v999_v35  ;;  %v995_v40 = vmin.f32 %v983_v36, 0.0  ;;  %v993_v42 = vmin.f32 %v981_v37, 0.0  ;;  %vm990_vm10 = vcmp.gt.f32.partialorder %v984_v32, 0.0 }
 0x200   : > { %v1003_v41 = vmul.f32 1.442695, %v994_v38  ;;  %v1007_v43 = vmul.f32 1.442695, %v996_v39  ;;  %vm989_vm11 = vcmp.gt.f32.partialorder %v983_v36, 0.0  ;;  %vm987_vm12 = vcmp.gt.f32.partialorder %v981_v37, 0.0 }
 0x201   : > { %v1005_v44 = vmul.f32 1.442695, %v995_v40  ;;  %v1001_v45 = vmul.f32 1.442695, %v993_v42  ;;  %v2805_v42 = vld [vmem:[%s5109_s6 + $0x1a8] sm:$0xff] }
 0x202   : > { %3984 = vpow2.f32 %v1003_v41  ;;  %v1132_v41 = vld [vmem:[%s5109_s6 + $0x120] sm:$0xff] }
 0x203   : > { %3986 = vpow2.f32 %v1007_v43  ;;  %v2806_v43 = vld [vmem:[%s5109_s6 + $0x1b0] sm:$0xff] }
 0x204   : > { %3988 = vpow2.f32 %v1005_v44  ;;  %v2790_v44 = vld [vmem:[%s5109_s6 + $0x130] sm:$0xff] }
 0x205   : > { %3990 = vpow2.f32 %v1001_v45  ;;  %v2807_v45 = vld [vmem:[%s5109_s6 + $0x1b8] sm:$0xff] }
 0x208   : > { %v3981_v47 = vpop.eup %3980 }
 0x209   : > { %v3983_v49 = vpop.eup %3982  ;;  %v2779_v50 = vadd.f32 -1.0, %v3981_v47  ;;  %v3699_v47 = vpack.c.bf16 %v2806_v43, %v2805_v42 }
 0x20a   : > { %v2780_v52 = vadd.f32 -1.0, %v3983_v49  ;;  %v3703_v49 = vpack.c.bf16 %v2808_v46, %v2807_v45 }
 0x20b   : > { %v1015_v54 = vsel %vm985_vm7, %v979_v22, %v2779_v50  ;;  %v2791_v50 = vld [vmem:[%s5109_s6 + $0x138] sm:$0xff]  ;;  %vm2209_vm7 = vcmask 1040384  }
 0x20c   : > { %v3985_v55 = vpop.eup %3984  ;;  %v1039_v56 = vmul.f32 %v1027_v48, %v1015_v54  ;;  %v1016_v58 = vsel %vm986_vm8, %v980_v25, %v2780_v52  ;;  %v2809_v52 = vld [vmem:[%s5109_s6 + $0x1c8] sm:$0xff]  ;;  %v3705_v54 = vpack.c.bf16 %v2792_v51, %v2791_v50  ;;  %v1568_v51 = vld [vmem:[%s5110_s7] sm:$0xff] }
 0x20d   : > { %v3987_v59 = vpop.eup %3986  ;;  %v2782_v60 = vadd.f32 -1.0, %v3985_v55  ;;  %v1040_v0 = vmul.f32 %v1031_v53, %v1016_v58  ;;  %v2811_v58 = vld [vmem:[%s5109_s6 + $0x1d8] sm:$0xff] }
 0x20e   : > { %v3989_v63 = vpop.eup %3988  ;;  %v2784_v3 = vadd.f32 -1.0, %v3987_v59  ;;  %v1063_v9 = vadd.f32 %v1051_v57, %v1039_v56  ;;  %v2793_v56 = vld [vmem:[%s5109_s6 + $0x148] sm:$0xff]  ;;  %v2812_v59 = vld [vmem:[%s5109_s6 + $0x1e0] sm:$0xff] }
 0x20f   : > { %v3991_v6 = vpop.eup %3990  ;;  %v1018_v7 = vsel %vm988_vm9, %v982_v31, %v2782_v60  ;;  %v2783_v8 = vadd.f32 -1.0, %v3989_v63  ;;  %v1064_v18 = vadd.f32 %v1055_v62, %v1040_v0  ;;  %v1130_v31 = vld [vmem:[%s5109_s6 + $0x110] sm:$0xff]  ;;  %v2796_v63 = vld [vmem:[%s5109_s6 + $0x160] sm:$0xff]  ;;  %v2813_v0 = vld [vmem:[%s5109_s6 + $0x1e8] sm:$0xff]  ;;  %vm2680_vm9 = vcmask 0  }
 0x210   : > { %v1042_v10 = vmul.f32 %v1027_v48, %v1018_v7  ;;  %v1020_v11 = vsel %vm990_vm10, %v984_v32, %v2784_v3  ;;  %v2781_v12 = vadd.f32 -1.0, %v3991_v6  ;;  %v1075_v22 = vrot.slane %v1063_v9, 1  ;;  %v1131_v32 = vld [vmem:[%s5109_s6 + $0x118] sm:$0xff]  ;;  %v2814_v3 = vld [vmem:[%s5109_s6 + $0x1f0] sm:$0xff]  ;;  %v2797_v7 = vld [vmem:[%s5109_s6 + $0x168] sm:$0xff] }
 0x211   : > { %v1044_v4 = vmul.f32 %v1035_v61, %v1020_v11  ;;  %v1019_v14 = vsel %vm989_vm11, %v983_v36, %v2783_v8  ;;  %v1078_v26 = vrot.slane %v1064_v18, 1  ;;  %v3715_v6 = vpack.c.bf16 %v2814_v3, %v2813_v0  ;;  %v2798_v8 = vld [vmem:[%s5109_s6 + $0x170] sm:$0xff]  ;;  %v1576_v0 = vld [vmem:[%s5110_s7 + $0x40] sm:$0xff]  ;;  %v1577_v3 = vld [vmem:[%s5110_s7 + $0x48] sm:$0xf] }
 0x212   : > { %v1066_v15 = vadd.f32 %v1051_v57, %v1042_v10  ;;  %v1043_v16 = vmul.f32 %v1031_v53, %v1019_v14  ;;  %v1017_v17 = vsel %vm987_vm12, %v981_v37, %v2781_v12  ;;  %v3695_v37 = vpack.c.bf16 %v1131_v32, %v1130_v31  ;;  %v2810_v53 = vld [vmem:[%s5109_s6 + $0x1d0] sm:$0xff]  ;;  %v2816_v10 = vld [vmem:[%s5109_s6 + $0x200] sm:$0xff] }
 0x213   : > { %v1068_v20 = vadd.f32 %v1059_v5, %v1044_v4  ;;  %v1041_v21 = vmul.f32 %v1035_v61, %v1017_v17  ;;  %v3707_v55 = vpack.c.bf16 %v2810_v53, %v2809_v52  ;;  %v2794_v57 = vld [vmem:[%s5109_s6 + $0x150] sm:$0xff]  ;;  %v3711_v61 = vpack.c.bf16 %v2812_v59, %v2811_v58  ;;  %v2799_v4 = vld [vmem:[%s5109_s6 + $0x178] sm:$0xff]  ;;  %v2800_v14 = vld [vmem:[%s5109_s6 + $0x180] sm:$0xff] }
 0x214   : > { %v1076_v19 = vrot.slane %v1066_v15, 1  ;;  %v1067_v23 = vadd.f32 %v1055_v62, %v1043_v16  ;;  %v3709_v60 = vpack.c.bf16 %v2794_v57, %v2793_v56  ;;  %v2795_v62 = vld [vmem:[%s5109_s6 + $0x158] sm:$0xff]  ;;  %v3717_v11 = vpack.c.bf16 %v2798_v8, %v2797_v7  ;;  %v2818_v16 = vld [vmem:[%s5109_s6 + $0x210] sm:$0xff]  ;;  %v1569_v52 = vld [vmem:[%s5110_s7 + $0x8] sm:$0xff] }
 0x215   : > { %v1082_v24 = vrot.slane %v1068_v20, 1  ;;  %v1065_v25 = vadd.f32 %v1059_v5, %v1041_v21  ;;  %v3713_v5 = vpack.c.bf16 %v2796_v63, %v2795_v62  ;;  %v3721_v17 = vpack.c.bf16 %v2800_v14, %v2799_v4  ;;  %v2802_v21 = vld [vmem:[%s5109_s6 + $0x190] sm:$0xff]  ;;  %v1481_v53 = vld [vmem:[%s5108_s5 + $0x8] sm:$0x7]  ;;  %v1571_v56 = vld [vmem:[%s5110_s7 + $0x18] sm:$0xff] }
 0x216   : > { %v1079_v27 = vrot.slane %v1067_v23, 1  ;;  %v1077_v28 = vsel %vm643_vm5, %v1075_v22, %v1076_v19  ;;  %v4457_v40 = vmax.f32 %v1066_v15, %v1076_v19  ;;  %v2817_v15 = vld [vmem:[%s5109_s6 + $0x208] sm:$0xff]  ;;  %v2819_v22 = vld [vmem:[%s5109_s6 + $0x218] sm:$0xff]  ;;  %v2820_v19 = vld [vmem:[%s5109_s6 + $0x220] sm:$0xff] }
 0x217   : > { %v1081_v29 = vrot.slane %v1065_v25, 1  ;;  %v4440_v30 = vmax.f32 %v1063_v9, %v1077_v28  ;;  %v1095_v38 = vmax.f32 %v1068_v20, %v1082_v24  ;;  %v2815_v9 = vld [vmem:[%s5109_s6 + $0x1f8] sm:$0xff]  ;;  %v2801_v20 = vld [vmem:[%s5109_s6 + $0x188] sm:$0xff]  ;;  %v1480_v28 = vld [vmem:[%s5108_s5] sm:$0xff] }
 0x218   : > { %v1080_v33 = vsel %vm643_vm5, %v1078_v26, %v1079_v27  ;;  %v4452_v39 = vmax.f32 %v1067_v23, %v1079_v27  ;;  %v3719_v12 = vpack.c.bf16 %v2816_v10, %v2815_v9  ;;  %v3725_v23 = vpack.c.bf16 %v2802_v21, %v2801_v20  ;;  %v2804_v26 = vld [vmem:[%s5109_s6 + $0x1a0] sm:$0xff]  ;;  %v1573_v59 = vld [vmem:[%s5110_s7 + $0x28] sm:$0xff]  ;;  %v1575_v62 = vld [vmem:[%s5110_s7 + $0x38] sm:$0xff] }
 0x219   : > { %v1091_v34 = vmax.f32 %v1064_v18, %v1080_v33  ;;  %v1083_v35 = vsel %vm643_vm5, %v1081_v29, %v1082_v24  ;;  %v3723_v18 = vpack.c.bf16 %v2818_v16, %v2817_v15  ;;  %v3727_v24 = vpack.c.bf16 %v2820_v19, %v2819_v22  ;;  %v1572_v58 = vld [vmem:[%s5110_s7 + $0x20] sm:$0xff]  ;;  %v2834_v7 = vld [vmem:[%s5110_s7 + $0x50] sm:$0xff]  ;;  %v2835_v8 = vld [vmem:[%s5110_s7 + $0x58] sm:$0xff] }
 0x21a   : > { %v1092_v36 = vmax.f32 %v1065_v25, %v1083_v35  ;;  %v2803_v25 = vld [vmem:[%s5109_s6 + $0x198] sm:$0xff]  ;;  %v3762_v9 = vpack.c.bf16 %v2835_v8, %v2834_v7  ;;  %vm2027_vm5 = vcmask 1042432   ;;  %v2838_v22 = vld [vmem:[%s5110_s7 + $0x70] sm:$0xff] }
 0x21b   : > { %1204 = vmatprep.mubr.f32.mxu0 %v1091_v34  ;;  %v3729_v27 = vpack.c.bf16 %v2804_v26, %v2803_v25  ;;  %v2839_v19 = vld [vmem:[%s5110_s7 + $0x78] sm:$0xff]  ;;  %v2872_v8 = vld [vmem:[%s5110_s7 + $0x150] sm:$0xff] }
 0x21c   : > { %3300 = vmatprep.mubr.msk.f32.mxu1 %vm1133_vm13, %v1092_v36  ;;  %1205 = vmatmul.mubr.f32.vlgmr.msra.gmra.mrb[8].mxu0 %v4440_v30  ;;  %v3768_v26 = vpack.c.bf16 %v2839_v19, %v2838_v22  ;;  %v2882_v22 = vld [vmem:[%s5110_s7 + $0x190] sm:$0xff]  ;;  %v2883_v19 = vld [vmem:[%s5110_s7 + $0x198] sm:$0xff] }
 0x21d   : > { %3694 = vmatpush3.bf16.msra.mxu0 %v4427_v13  ;;  %3301 = vmatmul.mubr.msk.f32.vlgmr.msra.gmra.mrb[4].mxu1 %vm1133_vm13, %v1095_v38  ;;  %v2789_v13 = vld [vmem:[%s5109_s6 + $0x128] sm:$0xff] }
 0x21e   : > { %1209 = vmatprep.mubr.f32.mxu0 %v4452_v39  ;;  %3696 = vmatprep.subr.bf16.mxu0 %v3695_v37  ;;  %v3701_v48 = vpack.c.bf16 %v2790_v44, %v2789_v13 }
 0x21f   : > { %3307 = vmatprep.mubr.msk.f32.mxu1 %vm1482_vm14, %v1480_v28  ;;  %v2841_v28 = vld [vmem:[%s5110_s7 + $0x88] sm:$0xff] }
 0x220   : > { %1210 = vmatmul.mubr.f32.gmra.mrb[10].mxu0 %v4457_v40 }
 0x221   : > { %3698 = vmatpush3.bf16.msra.mxu0 %v3695_v37  ;;  %3287 = vmatprep.mubr.msk.f32.mxu0 %vm1133_vm13, %v1092_v36 }
 0x222   : > { %3285 = vmatprep.subr.mxu0 %v1132_v41 }
 0x225   : > { %3286 = vmatpush3.msra.mxu0 %v1132_v41 }
 0x226   : > { %3288 = vmatmul.mubr.msk.f32.vlgmr.msra.gmra.mrb[12].mxu0 %vm1133_vm13, %v1095_v38  ;;  %3700 = vmatprep.subr.bf16.mxu0 %v3699_v47 }
 0x227   : > { %3702 = vmatpush3.bf16.msra.mxu0 %v3701_v48  ;;  %1392 = vmatprep.mubr.f32.mxu0 %v1091_v34 }
 0x228   : > { %3704 = vmatprep.subr.bf16.mxu0 %v3703_v49 }
 0x22b   : > { %3706 = vmatpush3.bf16.msra.mxu0 %v3705_v54  ;;  %v3746_v54 = vpack.c.bf16 %v1569_v52, %v1568_v51  ;;  %v2860_v52 = vld [vmem:[%s5110_s7 + $0x100] sm:$0xff] }
 0x22c   : > { %3708 = vmatprep.subr.bf16.mxu0 %v3707_v55  ;;  %v1570_v55 = vld [vmem:[%s5110_s7 + $0x10] sm:$0xff] }
 0x22d   : > { %v3749_v57 = vpack.c.bf16 %v1571_v56, %v1570_v55  ;;  %v2862_v55 = vld [vmem:[%s5110_s7 + $0x110] sm:$0xff]  ;;  %v2863_v56 = vld [vmem:[%s5110_s7 + $0x118] sm:$0xff] }
 0x22f   : > { %3710 = vmatpush3.bf16.msra.mxu0 %v3709_v60  ;;  %v3752_v60 = vpack.c.bf16 %v1573_v59, %v1572_v58  ;;  %v2864_v58 = vld [vmem:[%s5110_s7 + $0x120] sm:$0xff]  ;;  %v2865_v59 = vld [vmem:[%s5110_s7 + $0x128] sm:$0xff] }
 0x230   : > { %3712 = vmatprep.subr.bf16.mxu0 %v3711_v61  ;;  %v1574_v61 = vld [vmem:[%s5110_s7 + $0x30] sm:$0xff] }
 0x231   : > { %v3755_v63 = vpack.c.bf16 %v1575_v62, %v1574_v61  ;;  %v2866_v61 = vld [vmem:[%s5110_s7 + $0x130] sm:$0xff]  ;;  %v2867_v62 = vld [vmem:[%s5110_s7 + $0x138] sm:$0xf] }
 0x233   : > { %3714 = vmatpush3.bf16.msra.mxu0 %v3713_v5  ;;  %v3758_v5 = vpack.c.bf16 %v1577_v3, %v1576_v0  ;;  %v2870_v0 = vld [vmem:[%s5110_s7 + $0x140] sm:$0xff]  ;;  %v2871_v3 = vld [vmem:[%s5110_s7 + $0x148] sm:$0xff] }
 0x234   : > { %3716 = vmatprep.subr.bf16.mxu0 %v3715_v6 }
 0x237   : > { %3718 = vmatpush3.bf16.msra.mxu0 %v3717_v11  ;;  %v2836_v11 = vld [vmem:[%s5110_s7 + $0x60] sm:$0xff] }
 0x238   : > { %3720 = vmatprep.subr.bf16.mxu0 %v3719_v12  ;;  %v2837_v12 = vld [vmem:[%s5110_s7 + $0x68] sm:$0xff] }
 0x23b   : > { %3722 = vmatpush3.bf16.msra.mxu0 %v3721_v17  ;;  %v3765_v17 = vpack.c.bf16 %v2837_v12, %v2836_v11  ;;  %v2874_v11 = vld [vmem:[%s5110_s7 + $0x160] sm:$0xff]  ;;  %v2875_v12 = vld [vmem:[%s5110_s7 + $0x168] sm:$0xff] }
 0x23c   : > { %3724 = vmatprep.subr.bf16.mxu0 %v3723_v18 }
 0x23f   : > { %3726 = vmatpush3.bf16.msra.mxu0 %v3725_v23 }
 0x240   : > { %3728 = vmatprep.subr.bf16.mxu0 %v3727_v24 }
 0x243   : > { %3730 = vmatpush3.bf16.msra.mxu0 %v3729_v27  ;;  %v2840_v27 = vld [vmem:[%s5110_s7 + $0x80] sm:$0xff] }
 0x244   : > { %3873 = vmatprep.subr.bf16.mxu0 %v4006_v1 }
 0x246   : > { %1393 = vmatmul.mubr.f32.vlgmr.msra.gmra.mrb[14].mxu0 %v4440_v30 }
 0x247   : > { %1397 = vmatprep.mubr.f32.mxu0 %v4452_v39 }
 0x24a   : > { %1398 = vmatmul.mubr.f32.gmra.mrb[16].mxu0 %v4457_v40 }
 0x24b   : > { %3514 = vmatprep.mubr.msk.f32.mxu0 %vm4007_vm0, %v4008_v2 }
 0x2ef   : > { %v3024_v29 = vpop.f32.mrb[8].mxu0 }
 0x2f0   : > { %v3302_v31 = vpop.f32.mrb[4].mxu1  ;;  %v3025_v32 = vpop.f32.mrb[9].mxu0 }
 0x2f1   : > { %v3026_v33 = vadd.f32 %v3025_v32, %v3024_v29  ;;  %v1469_v34 = vpop.f32.mrb[5].mxu1  ;;  %v3771_v29 = vpack.c.bf16 %v2841_v28, %v2840_v27  ;;  %v2843_v32 = vld [vmem:[%s5110_s7 + $0x98] sm:$0xf]  ;;  %v2884_v28 = vld [vmem:[%s5110_s7 + $0x1a0] sm:$0xff] }
 0x2f3   : > { %v3027_v30 = vpop.f32.mrb[10].mxu0 }
 0x2f4   : > { %v3028_v35 = vpop.f32.mrb[11].mxu0 }
 0x2f5   : > { %v3029_v36 = vadd.f32 %v3028_v35, %v3027_v30  ;;  %v2847_v30 = vld [vmem:[%s5110_s7 + $0xa8] sm:$0xff] }
 0x2f9   : > { %v3289_v37 = vpop.f32.mrb[12].mxu0 }
 0x2fa   : > { %v1287_v38 = vadd.f32 %v3289_v37, %v3029_v36  ;;  %v1281_v39 = vpop.f32.mrb[13].mxu0  ;;  %v2848_v37 = vld [vmem:[%s5110_s7 + $0xb0] sm:$0xff] }
 0x2fb   : > { %v1282_v40 = vadd.f32 %v3026_v33, %v1281_v39 }
 0x319   : > { %v3069_v41 = vpop.f32.mrb[14].mxu0 }
 0x31a   : > { %v3070_v42 = vpop.f32.mrb[15].mxu0 }
 0x31b   : > { %v3071_v43 = vadd.f32 %v3070_v42, %v3069_v41  ;;  %v2851_v41 = vld [vmem:[%s5110_s7 + $0xc8] sm:$0xff] }
 0x31d   : > { %v1470_v13 = vadd.f32 %v3071_v43, %v1469_v34  ;;  %v3072_v44 = vpop.f32.mrb[16].mxu0  ;;  %v2846_v34 = vld [vmem:[%s5110_s7 + $0xa0] sm:$0xff]  ;;  %v2852_v43 = vld [vmem:[%s5110_s7 + $0xd0] sm:$0xff] }
 0x31e   : > { %v3073_v45 = vpop.f32.mrb[17].mxu0  ;;  %v3778_v35 = vpack.c.bf16 %v2847_v30, %v2846_v34  ;;  %v2888_v34 = vld [vmem:[%s5110_s7 + $0x1c0] sm:$0xff]  ;;  %v2889_v30 = vld [vmem:[%s5110_s7 + $0x1c8] sm:$0xff] }
 0x31f   : > { %v1478_v46 = vmax.f32 %v1282_v40, %v1470_v13  ;;  %v3074_v47 = vadd.f32 %v3073_v45, %v3072_v44  ;;  %v2850_v40 = vld [vmem:[%s5110_s7 + $0xc0] sm:$0xff]  ;;  %v2853_v13 = vld [vmem:[%s5110_s7 + $0xd8] sm:$0xff] }
 0x320   : > { %v3784_v42 = vpack.c.bf16 %v2851_v41, %v2850_v40  ;;  %v3787_v44 = vpack.c.bf16 %v2853_v13, %v2852_v43  ;;  %v2854_v45 = vld [vmem:[%s5110_s7 + $0xe0] sm:$0xff]  ;;  %v2895_v40 = vld [vmem:[%s5110_s7 + $0x1e8] sm:$0xff]  ;;  %v2897_v43 = vld [vmem:[%s5110_s7 + $0x1f8] sm:$0xff] }
 0x321   : > { %v1475_v48 = vadd.f32 %v3302_v31, %v3074_v47  ;;  %v2842_v31 = vld [vmem:[%s5110_s7 + $0x90] sm:$0xff] }
 0x322   : > { %v3774_v33 = vpack.c.bf16 %v2843_v32, %v2842_v31  ;;  %v2887_v32 = vld [vmem:[%s5110_s7 + $0x1b8] sm:$0xff] }
 0x323   : > { %v1479_v49 = vmax.f32 %v1287_v38, %v1475_v48  ;;  %v2849_v38 = vld [vmem:[%s5110_s7 + $0xb8] sm:$0xff]  ;;  %v2858_v48 = vld [vmem:[%s5110_s7 + $0xf0] sm:$0xff] }
 0x324   : > { %v3781_v39 = vpack.c.bf16 %v2849_v38, %v2848_v37  ;;  %v2891_v37 = vld [vmem:[%s5110_s7 + $0x1d8] sm:$0xf] }
 0x325   : > { %v3739_v50 = vpack.c.bf16 %v1479_v49, %v1478_v46  ;;  %v2855_v46 = vld [vmem:[%s5110_s7 + $0xe8] sm:$0xf]  ;;  %v2859_v49 = vld [vmem:[%s5110_s7 + $0xf8] sm:$0xff] }
 0x326   : > { %v3790_v47 = vpack.c.bf16 %v2855_v46, %v2854_v45  ;;  %v2899_v45 = vld [vmem:[%s5110_s7 + $0x208] sm:$0xff] }
 0x327   : > { %3741 = vmatprep.subr.msk.bf16.mxu1 %vm3740_vm1, %v3739_v50 }
 0x328   : > { %3744 = vmatpush3.bf16.msk.msra.mxu1 %vm3740_vm1, %v3739_v50  ;;  %v3794_v50 = vpack.c.bf16 %v2859_v49, %v2858_v48  ;;  %v2902_v49 = vld [vmem:[%s5110_s7 + $0x220] sm:$0xff] }
 0x329   : > { %3745 = vmatprep.subr.bf16.mxu1 %v4006_v1 }
 0x32b   : > { %3308 = vmatmul.mubr.msk.f32.vlgmr.msra.gmra.mrb[6].mxu1 %vm1482_vm14, %v1481_v53  ;;  %v2861_v53 = vld [vmem:[%s5110_s7 + $0x108] sm:$0xff] }
 0x32c   : > { %3747 = vmatpush3.bf16.msra.mxu1 %v3746_v54  ;;  %3330 = vmatprep.mubr.msk.f32.mxu1 %vm4007_vm0, %v4008_v2  ;;  %v3797_v54 = vpack.c.bf16 %v2861_v53, %v2860_v52  ;;  %v2906_v52 = vld [vmem:[%s5110_s7 + $0x230] sm:$0xff]  ;;  %v2907_v53 = vld [vmem:[%s5110_s7 + $0x238] sm:$0xff] }
 0x32d   : > { %3748 = vmatprep.subr.bf16.mxu1 %v4006_v1 }
 0x330   : > { %3750 = vmatpush3.bf16.msra.mxu1 %v3749_v57  ;;  %v3800_v57 = vpack.c.bf16 %v2863_v56, %v2862_v55  ;;  %v2908_v55 = vld [vmem:[%s5110_s7 + $0x240] sm:$0xff]  ;;  %v2909_v56 = vld [vmem:[%s5110_s7 + $0x248] sm:$0xff] }
 0x331   : > { %3751 = vmatprep.subr.bf16.mxu1 %v4006_v1 }
 0x334   : > { %3753 = vmatpush3.bf16.msra.mxu1 %v3752_v60  ;;  %v3803_v60 = vpack.c.bf16 %v2865_v59, %v2864_v58  ;;  %v2910_v58 = vld [vmem:[%s5110_s7 + $0x250] sm:$0xff]  ;;  %v2911_v59 = vld [vmem:[%s5110_s7 + $0x258] sm:$0xff] }
 0x335   : > { %3754 = vmatprep.subr.bf16.mxu1 %v4006_v1 }
 0x338   : > { %3756 = vmatpush3.bf16.msra.mxu1 %v3755_v63  ;;  %v3806_v63 = vpack.c.bf16 %v2867_v62, %v2866_v61  ;;  %v2913_v61 = vld [vmem:[%s5110_s7 + $0x268] sm:$0xff] }
 0x339   : > { %3757 = vmatprep.subr.bf16.mxu1 %v4006_v1 }
 0x33c   : > { %3760 = vmatpush3.bf16.msk.msra.mxu1 %vm4614_vm3, %v3758_v5  ;;  %v3810_v5 = vpack.c.bf16 %v2871_v3, %v2870_v0  ;;  %v2915_v0 = vld [vmem:[%s5110_s7 + $0x278] sm:$0xf] }
 0x33d   : > { %3761 = vmatprep.subr.bf16.mxu1 %v4006_v1 }
 0x3fe   : > { %v3309_v10 = vpop.f32.mrb[6].mxu1 }
 0x3ff   : > { %v2029_v4 = vrot.slane %v3309_v10, 5  ;;  %v2120_v14 = vrot.slane %v3309_v10, 6  ;;  %v2211_v15 = vrot.slane %v3309_v10, 7  ;;  %v4634_v16 = vpop.f32.mrb[7].mxu1 }
 0x400   : > { %3331 = vmatmul.mubr.msk.f32.vlgmr.msra.gmra.mrb[8].mxu1 %vm1578_vm4, %v4634_v16  ;;  %v2028_v18 = vrot.slane %v4634_v16, 5  ;;  %v2119_v20 = vrot.slane %v4634_v16, 6  ;;  %v2210_v21 = vrot.slane %v4634_v16, 7  ;;  %v1674_v36 = vrot.slane %v4634_v16, 1 }
 0x401   : > { %3763 = vmatpush3.bf16.msra.mxu1 %v3762_v9  ;;  %3353 = vmatprep.mubr.msk.f32.mxu1 %vm4007_vm0, %v4008_v2  ;;  %v1762_v51 = vrot.slane %v4634_v16, 2  ;;  %v1850_v7 = vrot.slane %v4634_v16, 3  ;;  %v2873_v9 = vld [vmem:[%s5110_s7 + $0x158] sm:$0xff]  ;;  %v1938_v27 = vrot.slane %v4634_v16, 4  ;;  %v2886_v16 = vld [vmem:[%s5110_s7 + $0x1b0] sm:$0xff] }
 0x402   : > { %3764 = vmatprep.subr.bf16.mxu1 %v4006_v1  ;;  %v4650_v23 = vsel %vm2027_vm5, %v2028_v18, %v2029_v4  ;;  %v4652_v24 = vsel %vm2118_vm6, %v2119_v20, %v2120_v14  ;;  %v4654_v25 = vsel %vm2209_vm7, %v2210_v21, %v2211_v15  ;;  %v3813_v10 = vpack.c.bf16 %v2873_v9, %v2872_v8  ;;  %v2876_v14 = vld [vmem:[%s5110_s7 + $0x170] sm:$0xff]  ;;  %v2877_v15 = vld [vmem:[%s5110_s7 + $0x178] sm:$0xff]  ;;  %v2878_v18 = vld [vmem:[%s5110_s7 + $0x180] sm:$0xff] }
 0x403   : > { %v3816_v4 = vpack.c.bf16 %v2875_v12, %v2874_v11  ;;  %v2879_v20 = vld [vmem:[%s5110_s7 + $0x188] sm:$0xf]  ;;  %v2319_v9 = vld [vmem:[%s5112_s9 + $0x10] sm:$0xff]  ;;  %v2321_v11 = vld [vmem:[%s5112_s9 + $0x20] sm:$0xff] }
 0x404   : > { %v3822_v21 = vpack.c.bf16 %v2879_v20, %v2878_v18  ;;  %v2322_v12 = vld [vmem:[%s5112_s9 + $0x28] sm:$0xff]  ;;  %v2325_v18 = vld [vmem:[%s5112_s9 + $0x40] sm:$0xff] }
 0x405   : > { %3766 = vmatpush3.bf16.msra.mxu1 %v3765_v17  ;;  %v3819_v17 = vpack.c.bf16 %v2877_v15, %v2876_v14  ;;  %v2323_v14 = vld [vmem:[%s5112_s9 + $0x30] sm:$0xff]  ;;  %v2324_v15 = vld [vmem:[%s5112_s9 + $0x38] sm:$0xff]  ;;  %v2326_v20 = vld [vmem:[%s5112_s9 + $0x48] sm:$0xf] }
 0x406   : > { %3767 = vmatprep.subr.bf16.mxu1 %v4006_v1 }
 0x409   : > { %3769 = vmatpush3.bf16.msra.mxu1 %v3768_v26  ;;  %v3826_v26 = vpack.c.bf16 %v2883_v19, %v2882_v22  ;;  %v2833_v22 = vld [vmem:[%s5111_s8] ss:$0 sm:$0xff] }
 0x40a   : > { %3770 = vmatprep.subr.bf16.mxu1 %v4006_v1 }
 0x40d   : > { %3772 = vmatpush3.bf16.msra.mxu1 %v3771_v29  ;;  %v2885_v29 = vld [vmem:[%s5110_s7 + $0x1a8] sm:$0xff] }
 0x40e   : > { %3773 = vmatprep.subr.bf16.mxu1 %v4006_v1  ;;  %v3829_v31 = vpack.c.bf16 %v2885_v29, %v2884_v28 }
 0x411   : > { %3776 = vmatpush3.bf16.msk.msra.mxu1 %vm4614_vm3, %v3774_v33  ;;  %v3832_v33 = vpack.c.bf16 %v2887_v32, %v2886_v16  ;;  %v2920_v32 = vld [vmem:[%s5111_s8 + $0x1] ss:$0 sm:$0xff] }
 0x412   : > { %3777 = vmatprep.subr.bf16.mxu1 %v4006_v1 }
 0x414   : > { %3354 = vmatmul.mubr.msk.f32.vlgmr.msra.gmra.mrb[8].mxu1 %vm1578_vm4, %v1674_v36  ;;  %v2890_v36 = vld [vmem:[%s5110_s7 + $0x1d0] sm:$0xff] }
 0x415   : > { %3779 = vmatpush3.bf16.msra.mxu1 %v3778_v35  ;;  %3376 = vmatprep.mubr.msk.f32.mxu1 %vm4007_vm0, %v4008_v2  ;;  %v3835_v35 = vpack.c.bf16 %v2889_v30, %v2888_v34  ;;  %v3838_v38 = vpack.c.bf16 %v2891_v37, %v2890_v36  ;;  %v2922_v34 = vld [vmem:[%s5111_s8 + $0x2] ss:$0 sm:$0xff]  ;;  %v2925_v36 = vld [vmem:[%s5112_s9 + $0x50] sm:$0xff]  ;;  %v2926_v37 = vld [vmem:[%s5112_s9 + $0x58] sm:$0xff] }
 0x416   : > { %3780 = vmatprep.subr.bf16.mxu1 %v4006_v1 }
 0x419   : > { %3782 = vmatpush3.bf16.msra.mxu1 %v3781_v39  ;;  %v2894_v39 = vld [vmem:[%s5110_s7 + $0x1e0] sm:$0xff] }
 0x41a   : > { %3783 = vmatprep.subr.bf16.mxu1 %v4006_v1  ;;  %v3842_v41 = vpack.c.bf16 %v2895_v40, %v2894_v39  ;;  %v3890_v39 = vpack.c.bf16 %v2926_v37, %v2925_v36  ;;  %v2672_v37 = vld [vmem:[#allocation2] sm:$0x1] }
 0x41d   : > { %3785 = vmatpush3.bf16.msra.mxu1 %v3784_v42  ;;  %v2896_v42 = vld [vmem:[%s5110_s7 + $0x1f0] sm:$0xff] }
 0x41e   : > { %3786 = vmatprep.subr.bf16.mxu1 %v4006_v1  ;;  %v3845_v13 = vpack.c.bf16 %v2897_v43, %v2896_v42  ;;  %v2928_v42 = vld [vmem:[%s5112_s9 + $0x68] sm:$0xff] }
 0x421   : > { %3788 = vmatpush3.bf16.msra.mxu1 %v3787_v44  ;;  %v2898_v44 = vld [vmem:[%s5110_s7 + $0x200] sm:$0xff] }
 0x422   : > { %3789 = vmatprep.subr.bf16.mxu1 %v4006_v1  ;;  %v3848_v46 = vpack.c.bf16 %v2899_v45, %v2898_v44  ;;  %v2930_v44 = vld [vmem:[%s5112_s9 + $0x78] sm:$0xff] }
 0x425   : > { %3792 = vmatpush3.bf16.msk.msra.mxu1 %vm4614_vm3, %v3790_v47  ;;  %v2901_v47 = vld [vmem:[%s5110_s7 + $0x218] sm:$0xff] }
 0x426   : > { %3793 = vmatprep.subr.bf16.mxu1 %v4006_v1 }
 0x428   : > { %3377 = vmatmul.mubr.msk.f32.vlgmr.msra.gmra.mrb[8].mxu1 %vm1578_vm4, %v1762_v51 }
 0x429   : > { %3795 = vmatpush3.bf16.msra.mxu1 %v3794_v50  ;;  %3399 = vmatprep.mubr.msk.f32.mxu1 %vm4007_vm0, %v4008_v2  ;;  %v2903_v50 = vld [vmem:[%s5110_s7 + $0x228] sm:$0xf] }
 0x42a   : > { %3796 = vmatprep.subr.bf16.mxu1 %v4006_v1  ;;  %v3854_v51 = vpack.c.bf16 %v2903_v50, %v2902_v49  ;;  %v2934_v49 = vld [vmem:[%s5112_s9 + $0x98] sm:$0xf] }
 0x42d   : > { %3798 = vmatpush3.bf16.msra.mxu1 %v3797_v54  ;;  %v3858_v54 = vpack.c.bf16 %v2907_v53, %v2906_v52  ;;  %v2938_v52 = vld [vmem:[%s5112_s9 + $0xa8] sm:$0xff] }
 0x42e   : > { %3799 = vmatprep.subr.bf16.mxu1 %v4006_v1 }
 0x431   : > { %3801 = vmatpush3.bf16.msra.mxu1 %v3800_v57  ;;  %v3861_v57 = vpack.c.bf16 %v2909_v56, %v2908_v55  ;;  %v2940_v55 = vld [vmem:[%s5112_s9 + $0xb8] sm:$0xff] }
 0x432   : > { %3802 = vmatprep.subr.bf16.mxu1 %v4006_v1 }
 0x435   : > { %3804 = vmatpush3.bf16.msra.mxu1 %v3803_v60  ;;  %v3864_v60 = vpack.c.bf16 %v2911_v59, %v2910_v58  ;;  %v2942_v58 = vld [vmem:[%s5112_s9 + $0xc8] sm:$0xff] }
 0x436   : > { %3805 = vmatprep.subr.bf16.mxu1 %v4006_v1 }
 0x439   : > { %3808 = vmatpush3.bf16.msk.msra.mxu1 %vm4614_vm3, %v3806_v63  ;;  %v2914_v63 = vld [vmem:[%s5110_s7 + $0x270] sm:$0xff] }
 0x43a   : > { %3809 = vmatprep.subr.bf16.mxu1 %v4006_v1  ;;  %v3870_v3 = vpack.c.bf16 %v2915_v0, %v2914_v63  ;;  %v2946_v63 = vld [vmem:[%s5112_s9 + $0xe8] sm:$0xf] }
 0x43c   : > { %3400 = vmatmul.mubr.msk.f32.vlgmr.msra.gmra.mrb[8].mxu1 %vm1578_vm4, %v1850_v7  ;;  %v2318_v7 = vld [vmem:[%s5112_s9 + $0x8] sm:$0xff] }
 0x43d   : > { %3811 = vmatpush3.bf16.msra.mxu1 %v3810_v5  ;;  %3422 = vmatprep.mubr.msk.f32.mxu1 %vm4007_vm0, %v4008_v2  ;;  %v2317_v5 = vld [vmem:[%s5112_s9] sm:$0xff] }
 0x43e   : > { %3812 = vmatprep.subr.bf16.mxu1 %v4006_v1  ;;  %v3874_v8 = vpack.c.bf16 %v2318_v7, %v2317_v5  ;;  %v2950_v5 = vld [vmem:[%s5112_s9 + $0xf8] sm:$0xff] }
 0x440   : > { %3875 = vmatpush3.bf16.msra.mxu0 %v3874_v8  ;;  %v2951_v8 = vld [vmem:[%s5112_s9 + $0x100] sm:$0xff] }
 0x441   : > { %3814 = vmatpush3.bf16.msra.mxu1 %v3813_v10  ;;  %3876 = vmatprep.subr.bf16.mxu0 %v4006_v1 }
 0x442   : > { %3815 = vmatprep.subr.bf16.mxu1 %v4006_v1 }
 0x445   : > { %3817 = vmatpush3.bf16.msra.mxu1 %v3816_v4  ;;  %v3880_v4 = vpack.c.bf16 %v2322_v12, %v2321_v11  ;;  %v2954_v11 = vld [vmem:[%s5112_s9 + $0x118] sm:$0xff] }
 0x446   : > { %3818 = vmatprep.subr.bf16.mxu1 %v4006_v1 }
 0x449   : > { %3820 = vmatpush3.bf16.msra.mxu1 %v3819_v17  ;;  %v3883_v17 = vpack.c.bf16 %v2324_v15, %v2323_v14  ;;  %v2957_v15 = vld [vmem:[%s5112_s9 + $0x130] sm:$0xff] }
 0x44a   : > { %3821 = vmatprep.subr.bf16.mxu1 %v4006_v1 }
 0x44d   : > { %3824 = vmatpush3.bf16.msk.msra.mxu1 %vm4614_vm3, %v3822_v21  ;;  %v3886_v21 = vpack.c.bf16 %v2326_v20, %v2325_v18 }
 0x44e   : > { %3825 = vmatprep.subr.bf16.mxu1 %v4006_v1 }
 0x450   : > { %3423 = vmatmul.mubr.msk.f32.vlgmr.msra.gmra.mrb[8].mxu1 %vm1578_vm4, %v1938_v27 }
 0x451   : > { %3827 = vmatpush3.bf16.msra.mxu1 %v3826_v26  ;;  %3445 = vmatprep.mubr.msk.f32.mxu1 %vm4007_vm0, %v4008_v2 }
 0x452   : > { %3828 = vmatprep.subr.bf16.mxu1 %v4006_v1 }
 0x455   : > { %3830 = vmatpush3.bf16.msra.mxu1 %v3829_v31 }
 0x456   : > { %3831 = vmatprep.subr.bf16.mxu1 %v4006_v1 }
 0x459   : > { %3833 = vmatpush3.bf16.msra.mxu1 %v3832_v33 }
 0x45a   : > { %3834 = vmatprep.subr.bf16.mxu1 %v4006_v1 }
 0x45d   : > { %3836 = vmatpush3.bf16.msra.mxu1 %v3835_v35 }
 0x45e   : > { %3837 = vmatprep.subr.bf16.mxu1 %v4006_v1 }
 0x461   : > { %3840 = vmatpush3.bf16.msk.msra.mxu1 %vm4614_vm3, %v3838_v38 }
 0x462   : > { %3841 = vmatprep.subr.bf16.mxu1 %v4006_v1 }
 0x464   : > { %3446 = vmatmul.mubr.msk.f32.vlgmr.msra.gmra.mrb[8].mxu1 %vm1578_vm4, %v4650_v23  ;;  %v2900_v23 = vld [vmem:[%s5110_s7 + $0x210] sm:$0xff] }
 0x465   : > { %3843 = vmatpush3.bf16.msra.mxu1 %v3842_v41  ;;  %3468 = vmatprep.mubr.msk.f32.mxu1 %vm4007_vm0, %v4008_v2  ;;  %v3851_v48 = vpack.c.bf16 %v2901_v47, %v2900_v23  ;;  %v2927_v41 = vld [vmem:[%s5112_s9 + $0x60] sm:$0xff]  ;;  %v2932_v23 = vld [vmem:[%s5112_s9 + $0x88] sm:$0xff] }
 0x466   : > { %3844 = vmatprep.subr.bf16.mxu1 %v4006_v1  ;;  %v3893_v43 = vpack.c.bf16 %v2928_v42, %v2927_v41 }
 0x469   : > { %3846 = vmatpush3.bf16.msra.mxu1 %v3845_v13  ;;  %v2929_v13 = vld [vmem:[%s5112_s9 + $0x70] sm:$0xff] }
 0x46a   : > { %3847 = vmatprep.subr.bf16.mxu1 %v4006_v1  ;;  %v3896_v45 = vpack.c.bf16 %v2930_v44, %v2929_v13 }
 0x46d   : > { %3849 = vmatpush3.bf16.msra.mxu1 %v3848_v46  ;;  %v2931_v46 = vld [vmem:[%s5112_s9 + $0x80] sm:$0xff] }
 0x46e   : > { %3850 = vmatprep.subr.bf16.mxu1 %v4006_v1  ;;  %v3899_v47 = vpack.c.bf16 %v2932_v23, %v2931_v46 }
 0x471   : > { %3852 = vmatpush3.bf16.msra.mxu1 %v3851_v48  ;;  %v2933_v48 = vld [vmem:[%s5112_s9 + $0x90] sm:$0xff] }
 0x472   : > { %3853 = vmatprep.subr.bf16.mxu1 %v4006_v1  ;;  %v3902_v50 = vpack.c.bf16 %v2934_v49, %v2933_v48 }
 0x475   : > { %3856 = vmatpush3.bf16.msk.msra.mxu1 %vm4614_vm3, %v3854_v51  ;;  %v2937_v51 = vld [vmem:[%s5112_s9 + $0xa0] sm:$0xff] }
 0x476   : > { %3857 = vmatprep.subr.bf16.mxu1 %v4006_v1  ;;  %v3906_v53 = vpack.c.bf16 %v2938_v52, %v2937_v51 }
 0x478   : > { %3469 = vmatmul.mubr.msk.f32.vlgmr.msra.gmra.mrb[8].mxu1 %vm1578_vm4, %v4652_v24  ;;  %v2912_v24 = vld [vmem:[%s5110_s7 + $0x260] sm:$0xff] }
 0x479   : > { %3859 = vmatpush3.bf16.msra.mxu1 %v3858_v54  ;;  %3491 = vmatprep.mubr.msk.f32.mxu1 %vm4007_vm0, %v4008_v2  ;;  %v3867_v62 = vpack.c.bf16 %v2913_v61, %v2912_v24  ;;  %v2939_v54 = vld [vmem:[%s5112_s9 + $0xb0] sm:$0xff]  ;;  %v2944_v24 = vld [vmem:[%s5112_s9 + $0xd8] sm:$0xff] }
 0x47a   : > { %3860 = vmatprep.subr.bf16.mxu1 %v4006_v1  ;;  %v3909_v56 = vpack.c.bf16 %v2940_v55, %v2939_v54 }
 0x47d   : > { %3862 = vmatpush3.bf16.msra.mxu1 %v3861_v57  ;;  %v2941_v57 = vld [vmem:[%s5112_s9 + $0xc0] sm:$0xff] }
 0x47e   : > { %3863 = vmatprep.subr.bf16.mxu1 %v4006_v1  ;;  %v3912_v59 = vpack.c.bf16 %v2942_v58, %v2941_v57 }
 0x481   : > { %3865 = vmatpush3.bf16.msra.mxu1 %v3864_v60  ;;  %v2943_v60 = vld [vmem:[%s5112_s9 + $0xd0] sm:$0xff] }
 0x482   : > { %3866 = vmatprep.subr.bf16.mxu1 %v4006_v1  ;;  %v3915_v61 = vpack.c.bf16 %v2944_v24, %v2943_v60 }
 0x485   : > { %3868 = vmatpush3.bf16.msra.mxu1 %v3867_v62  ;;  %v2945_v62 = vld [vmem:[%s5112_s9 + $0xe0] sm:$0xff] }
 0x486   : > { %3869 = vmatprep.subr.bf16.mxu1 %v4006_v1  ;;  %v3918_v0 = vpack.c.bf16 %v2946_v63, %v2945_v62 }
 0x489   : > { %3872 = vmatpush3.bf16.msk.msra.mxu1 %vm4614_vm3, %v3870_v3  ;;  %v2949_v3 = vld [vmem:[%s5112_s9 + $0xf0] sm:$0xff] }
 0x48a   : > { %v3922_v7 = vpack.c.bf16 %v2950_v5, %v2949_v3 }
 0x48c   : > { %3492 = vmatmul.mubr.msk.f32.vlgmr.msra.gmra.mrb[8].mxu1 %vm1578_vm4, %v4654_v25  ;;  %v2320_v25 = vld [vmem:[%s5112_s9 + $0x18] sm:$0xff] }
 0x48d   : > { %v3877_v10 = vpack.c.bf16 %v2320_v25, %v2319_v9  ;;  %v2952_v9 = vld [vmem:[%s5112_s9 + $0x108] sm:$0xff] }
 0x48e   : > { %v3925_v25 = vpack.c.bf16 %v2952_v9, %v2951_v8 }
 0x48f   : > { %3878 = vmatpush3.bf16.msra.mxu0 %v3877_v10  ;;  %v2953_v10 = vld [vmem:[%s5112_s9 + $0x110] sm:$0xff] }
 0x490   : > { %3879 = vmatprep.subr.bf16.mxu0 %v4006_v1  ;;  %v3928_v12 = vpack.c.bf16 %v2954_v11, %v2953_v10 }
 0x493   : > { %3881 = vmatpush3.bf16.msra.mxu0 %v3880_v4  ;;  %v2955_v4 = vld [vmem:[%s5112_s9 + $0x120] sm:$0xff] }
 0x494   : > { %3882 = vmatprep.subr.bf16.mxu0 %v4006_v1 }
 0x497   : > { %3884 = vmatpush3.bf16.msra.mxu0 %v3883_v17  ;;  %v2958_v17 = vld [vmem:[%s5112_s9 + $0x138] sm:$0xf] }
 0x498   : > { %3885 = vmatprep.subr.bf16.mxu0 %v4006_v1  ;;  %v3934_v18 = vpack.c.bf16 %v2958_v17, %v2957_v15 }
 0x49b   : > { %3888 = vmatpush3.bf16.msk.msra.mxu0 %vm4614_vm3, %v3886_v21 }
 0x49c   : > { %3889 = vmatprep.subr.bf16.mxu0 %v4006_v1 }
 0x55f   : > { %v2284_v19 = vpop.f32.mrb[8].mxu1 }
 0x560   : > { %v3937_v26 = vadd.f32 %v2833_v22, %v2284_v19  ;;  %v3493_v27 = vpop.f32.mrb[9].mxu1 }
 0x562   : > { %v2290_v28 = vmin.f32 %v3937_v26, 0.0  ;;  %vm2289_vm8 = vcmp.gt.f32.partialorder %v3937_v26, 0.0 }
 0x564   : > { %v2291_v29 = vmul.f32 1.442695, %v2290_v28 }
 0x566   : > { %3992 = vpow2.f32 %v2291_v29 }
 0x570   : > { %v3993_v31 = vpop.eup %3992 }
 0x571   : > { %v2918_v16 = vadd.f32 -1.0, %v3993_v31  ;;  %v2658_v31 = vld [vmem:[%s5113_s10] sm:$0x3] }
 0x573   : > { %v2294_v33 = vsel %vm2289_vm8, %v3937_v26, %v2918_v16  ;;  %v2661_v16 = vrot.slane %v2658_v31, 7 }
 0x574   : > { %v2303_v30 = vmul.f32 %v2920_v32, %v2294_v33 }
 0x576   : > { %v2312_v35 = vadd.f32 %v2922_v34, %v2303_v30 }
 0x578   : > { %v2314_v38 = vrot.slane %v2312_v35, 1 }
 0x57a   : > { %v4973_v40 = vmax.f32 %v2312_v35, %v2314_v38 }
 0x57c   : > { %3515 = vmatmul.mubr.msk.f32.vlgmr.msra.gmra.mrb[18].mxu0 %vm1578_vm4, %v4973_v40 }
 0x57d   : > { %3891 = vmatpush3.bf16.msra.mxu0 %v3890_v39  ;;  %3537 = vmatprep.mubr.msk.f32.mxu0 %vm4007_vm0, %v4008_v2 }
 0x57e   : > { %3892 = vmatprep.subr.bf16.mxu0 %v4006_v1 }
 0x581   : > { %3894 = vmatpush3.bf16.msra.mxu0 %v3893_v43 }
 0x582   : > { %3895 = vmatprep.subr.bf16.mxu0 %v4006_v1 }
 0x585   : > { %3897 = vmatpush3.bf16.msra.mxu0 %v3896_v45 }
 0x586   : > { %3898 = vmatprep.subr.bf16.mxu0 %v4006_v1 }
 0x589   : > { %3900 = vmatpush3.bf16.msra.mxu0 %v3899_v47 }
 0x58a   : > { %3901 = vmatprep.subr.bf16.mxu0 %v4006_v1 }
 0x58d   : > { %3904 = vmatpush3.bf16.msk.msra.mxu0 %vm4614_vm3, %v3902_v50 }
 0x58e   : > { %3905 = vmatprep.subr.bf16.mxu0 %v4006_v1 }
 0x590   : > { %3538 = vmatmul.mubr.msk.f32.vlgmr.msra.gmra.mrb[20].mxu0 %vm1578_vm4, %v4973_v40 }
 0x591   : > { %3907 = vmatpush3.bf16.msra.mxu0 %v3906_v53  ;;  %3560 = vmatprep.mubr.msk.f32.mxu0 %vm4007_vm0, %v4008_v2 }
 0x592   : > { %3908 = vmatprep.subr.bf16.mxu0 %v4006_v1 }
 0x595   : > { %3910 = vmatpush3.bf16.msra.mxu0 %v3909_v56 }
 0x596   : > { %3911 = vmatprep.subr.bf16.mxu0 %v4006_v1 }
 0x599   : > { %3913 = vmatpush3.bf16.msra.mxu0 %v3912_v59 }
 0x59a   : > { %3914 = vmatprep.subr.bf16.mxu0 %v4006_v1 }
 0x59d   : > { %3916 = vmatpush3.bf16.msra.mxu0 %v3915_v61 }
 0x59e   : > { %3917 = vmatprep.subr.bf16.mxu0 %v4006_v1 }
 0x5a1   : > { %3920 = vmatpush3.bf16.msk.msra.mxu0 %vm4614_vm3, %v3918_v0 }
 0x5a2   : > { %3921 = vmatprep.subr.bf16.mxu0 %v4006_v1 }
 0x5a4   : > { %3561 = vmatmul.mubr.msk.f32.vlgmr.msra.gmra.mrb[22].mxu0 %vm1578_vm4, %v4973_v40 }
 0x5a5   : > { %3923 = vmatpush3.bf16.msra.mxu0 %v3922_v7  ;;  %3583 = vmatprep.mubr.msk.f32.mxu0 %vm4007_vm0, %v4008_v2  ;;  %v2956_v2 = vld [vmem:[%s5112_s9 + $0x128] sm:$0xff]  ;;  %vm2668_vm0 = vcmask 122880  }
 0x5a6   : > { %3924 = vmatprep.subr.bf16.mxu0 %v4006_v1  ;;  %v3931_v14 = vpack.c.bf16 %v2956_v2, %v2955_v4 }
 0x5a9   : > { %3926 = vmatpush3.bf16.msra.mxu0 %v3925_v25 }
 0x5aa   : > { %3927 = vmatprep.subr.bf16.mxu0 %v4006_v1 }
 0x5ad   : > { %3929 = vmatpush3.bf16.msra.mxu0 %v3928_v12 }
 0x5ae   : > { %3930 = vmatprep.subr.bf16.mxu0 %v4006_v1 }
 0x5b1   : > { %3932 = vmatpush3.bf16.msra.mxu0 %v3931_v14 }
 0x5b2   : > { %3933 = vmatprep.subr.bf16.mxu0 %v4006_v1 }
 0x5b5   : > { %3936 = vmatpush3.bf16.msk.msra.mxu0 %vm4614_vm3, %v3934_v18 }
 0x5b8   : > { %3584 = vmatmul.mubr.msk.f32.vlgmr.msra.gmra.mrb[24].mxu0 %vm1578_vm4, %v4973_v40 }
 0x64f   : > { %v2399_v20 = vpop.f32.mrb[18].mxu0 }
 0x650   : > { %v3516_v21 = vpop.f32.mrb[19].mxu0 }
 0x663   : > { %v2483_v22 = vpop.f32.mrb[20].mxu0 }
 0x664   : > { %v2487_v19 = vmax.f32 %v2399_v20, %v2483_v22  ;;  %v3539_v26 = vpop.f32.mrb[21].mxu0 }
 0x677   : > { %v2568_v27 = vpop.f32.mrb[22].mxu0 }
 0x678   : > { %v2572_v28 = vmax.f32 %v2487_v19, %v2568_v27  ;;  %v3562_v29 = vpop.f32.mrb[23].mxu0 }
 0x68b   : > { %v2653_v1 = vpop.f32.mrb[24].mxu0 }
 0x68c   : > { %v2657_v32 = vmax.f32 %v2572_v28, %v2653_v1  ;;  %v3585_v6 = vpop.f32.mrb[25].mxu0 }
 0x68e   : > { %v2663_v33 = vmul.f32 %v2661_v16, %v2657_v32  ;;  %v2659_v34 = vmul.f32 %v2658_v31, %v2657_v32 }
 0x690   : > { %v2665_v30 = vrot.slane %v2663_v33, 2 }
 0x692   : > { %v2667_v35 = vadd.f32 %v2665_v30, %v2659_v34 }
 0x694   : > { %v2669_v36 = vsel %vm2668_vm0, %v2667_v35, 0.0 }
 0x695   : > { %2670 = vadd.xlane.f32.xlu1 %v2669_v36 }
 0x722   : > { %v2671_v38 = vpop.xlane.xlu1 %2670 }
 0x723   : > { %v2673_v39 = vadd.f32 %v2672_v37, %v2671_v38 }
 0x725   : > { %v2674_v40 = vsub.f32 0.0, %v2673_v39 }
 0x727   : > { %v2675_v41 = vmul.f32 1.442695, %v2674_v40 }
 0x729   : > { %3994 = vpow2.f32 %v2675_v41 }
 0x733   : > { %v3995_v42 = vpop.eup %3994 }
 0x734   : > { %v2677_v43 = vadd.f32 1.0, %v3995_v42 }
 0x736   : > { %3996 = vrcp.f32 %v2677_v43 }
 0x740   : > { %v3997_v13 = vpop.eup %3996 }
 0x741   : > { %2681 = vst.msk [vmem:[%s411_s29] sm:$0x1] %vm2680_vm9, %v3997_v13 }
 0x742 PF: > { %s24_s23 = sadd.s32 1, %s4004_s23  }
 0x743   : > { %p21_p4 = scmp.ge.s32.totalorder %s24_s23, 4  }
 0x745   :  { %23 = sbr.rel (!%p21_p4) target bundleno = 3 (0x3), region = 116 }

</bundles_post_ra>
